<compile_context>
chip_gen: v7x
topology: tpu7x:2x2x1
jax: 0.10.0
libtpu: 0.0.40
codegen_flags: <defaults>
</compile_context>

<pallas_src>
import functools

import jax
import jax.numpy as jnp
from jax.experimental import pallas as pl
from jax.experimental.pallas import tpu as pltpu

LANE = 128           # lane width: pad last dims to multiples of this
TILE_C_MAX = 4096    # vocab tile for the Linear layer (multiple of 128)
NEG_INF = -1e30      # bias padding so padded classes never win the softmax


def _round_up(x, m):
    return (x + m - 1) // m * m


def decoder_rnn_kernel(
    x_ref, h_ref,            # [B, Hp] f32 (embedded tokens, previous hidden)
    wi_ref, wh_ref,          # [Hp, 3*Hp] bf16 (fused input / hidden GRU weights, r|z|n)
    bi_ref,                  # [1, 3*Hp] f32  (b_ir+b_hr | b_iz+b_hz | b_in)
    bhn_ref,                 # [1, Hp]   f32  (b_hn, applied inside r * (...))
    wlin_ref, blin_ref,      # [Hp, tile_c] bf16 / [1, tile_c] f32 (current vocab tile)
    out_ref,                 # [1, B, tile_c] f32 raw logits for the current vocab tile
    lse_ref,                 # [1, B, 1] f32 partial logsumexp for this vocab partition
    hnew_ref,                # [1, B, Hp] f32 new hidden state (per partition copy)
    hbf_ref,                 # VMEM scratch [B, Hp] bf16 (h_new for the Linear matmuls)
    m_ref, s_ref,            # VMEM scratch [B, 1] f32 (online max / sum-exp)
):
    c = pl.program_id(1)           # vocab-tile step within this partition
    n_c = pl.num_programs(1)
    Hp = h_ref.shape[-1]

    @pl.when(c == 0)
    def _first_tile():
        # ReLU(embedded) and the fused GRU cell (PyTorch gate order r, z, n).
        x = jnp.maximum(x_ref[...], 0.0).astype(jnp.bfloat16)
        h = h_ref[...]                                                   # f32
        gi = jnp.dot(x, wi_ref[...], preferred_element_type=jnp.float32) + bi_ref[...]
        gh = jnp.dot(h.astype(jnp.bfloat16), wh_ref[...],
                     preferred_element_type=jnp.float32)
        r = jax.nn.sigmoid(gi[:, :Hp] + gh[:, :Hp])
        z = jax.nn.sigmoid(gi[:, Hp:2 * Hp] + gh[:, Hp:2 * Hp])
        n = jnp.tanh(gi[:, 2 * Hp:] + r * (gh[:, 2 * Hp:] + bhn_ref[...]))
        h_new = (1.0 - z) * n + z * h
        hnew_ref[0] = h_new
        hbf_ref[...] = h_new.astype(jnp.bfloat16)
        # Init online log-softmax statistics for this vocab partition.
        m_ref[...] = jnp.full(m_ref.shape, -jnp.inf, m_ref.dtype)
        s_ref[...] = jnp.zeros(s_ref.shape, s_ref.dtype)

    # Linear layer for the current vocab tile (MXU, bf16 in / f32 accumulate).
    logits = jnp.dot(hbf_ref[...], wlin_ref[...],
                     preferred_element_type=jnp.float32) + blin_ref[...]
    out_ref[0] = logits                       # raw logits stream straight back to HBM

    # Online max / sum-exp accumulation (flash-softmax style).
    m_prev = m_ref[...]
    m_new = jnp.maximum(m_prev, jnp.max(logits, axis=1, keepdims=True))
    s_ref[...] = (s_ref[...] * jnp.exp(m_prev - m_new)
                  + jnp.sum(jnp.exp(logits - m_new), axis=1, keepdims=True))
    m_ref[...] = m_new

    @pl.when(c == n_c - 1)
    def _emit_lse():
        lse_ref[0] = m_ref[...] + jnp.log(s_ref[...])


def init_params(key, hidden_size, output_classes):
    """Raw (un-padded, f32) parameters mirroring the PyTorch module."""
    ks = jax.random.split(key, 16)
    bound = 1.0 / jnp.sqrt(hidden_size)

    def unif(k, shape):
        return jax.random.uniform(k, shape, jnp.float32, -bound, bound)

    # nn.Embedding: N(0, 1). GRU/Linear weights stored pre-transposed as [in, out].
    return {
        "emb": jax.random.normal(ks[0], (output_classes, hidden_size), jnp.float32),
        "w_ir": unif(ks[1], (hidden_size, hidden_size)),
        "w_iz": unif(ks[2], (hidden_size, hidden_size)),
        "w_in": unif(ks[3], (hidden_size, hidden_size)),
        "w_hr": unif(ks[4], (hidden_size, hidden_size)),
        "w_hz": unif(ks[5], (hidden_size, hidden_size)),
        "w_hn": unif(ks[6], (hidden_size, hidden_size)),
        "b_ir": unif(ks[7], (1, hidden_size)),
        "b_iz": unif(ks[8], (1, hidden_size)),
        "b_in": unif(ks[9], (1, hidden_size)),
        "b_hr": unif(ks[10], (1, hidden_size)),
        "b_hz": unif(ks[11], (1, hidden_size)),
        "b_hn": unif(ks[12], (1, hidden_size)),
        "w_lin": unif(ks[13], (hidden_size, output_classes)),
        "b_lin": unif(ks[14], (1, output_classes)),
    }


def pack_params(raw, tile_c_max=TILE_C_MAX):
    """Pad to lane-dense shapes, fuse GRU gates, pre-add biases, cast weights to bf16."""
    H = raw["w_ir"].shape[0]
    C = raw["w_lin"].shape[1]
    Hp = _round_up(H, LANE)
    Cp = _round_up(C, LANE)
    tile_c = min(Cp, _round_up(tile_c_max, LANE))
    Cp = _round_up(Cp, tile_c)

    def pad2(a, rows, cols, value=0.0):
        return jnp.pad(a, ((0, rows - a.shape[0]), (0, cols - a.shape[1])),
                       constant_values=value)

    w_i = jnp.concatenate(
        [pad2(raw["w_ir"], Hp, Hp), pad2(raw["w_iz"], Hp, Hp), pad2(raw["w_in"], Hp, Hp)],
        axis=1).astype(jnp.bfloat16)
    w_h = jnp.concatenate(
        [pad2(raw["w_hr"], Hp, Hp), pad2(raw["w_hz"], Hp, Hp), pad2(raw["w_hn"], Hp, Hp)],
        axis=1).astype(jnp.bfloat16)
    b_i = jnp.concatenate(
        [pad2(raw["b_ir"] + raw["b_hr"], 1, Hp),
         pad2(raw["b_iz"] + raw["b_hz"], 1, Hp),
         pad2(raw["b_in"], 1, Hp)], axis=1)
    b_hn = pad2(raw["b_hn"], 1, Hp)
    # TODO(synk): fp8 (v7x) / int8 (v5e,v6e) w_lin with per-tile scale to halve HBM traffic.
    w_lin = pad2(raw["w_lin"], Hp, Cp).astype(jnp.bfloat16)
    b_lin = pad2(raw["b_lin"], 1, Cp, value=NEG_INF)
    emb = pad2(raw["emb"], raw["emb"].shape[0], Hp)

    return {
        "emb": emb, "w_i": w_i, "w_h": w_h, "b_i": b_i, "b_hn": b_hn,
        "w_lin": w_lin, "b_lin": b_lin,
        "H": H, "C": C, "Hp": Hp, "Cp": Cp, "tile_c": tile_c,
    }


def _const_spec(block_shape, single_buffer):
    """BlockSpec with a constant index_map; single-buffered when supported."""
    index_map = lambda p, c: tuple(0 for _ in block_shape)
    if single_buffer:
        try:
            return pl.BlockSpec(block_shape, index_map,
                                pipeline_mode=pl.Buffered(buffer_count=1))
        except (TypeError, AttributeError):
            pass
    return pl.BlockSpec(block_shape, index_map)


def decoder_rnn_forward(token_ids, hidden, params, single_buffer=True):
    """token_ids: int32 [B]; hidden: f32 [1, B, H]. Returns (log_probs [B, C], hidden [1, B, H])."""
    B = token_ids.shape[0]
    H, C = params["H"], params["C"]
    Hp, Cp, tile_c = params["Hp"], params["Cp"], params["tile_c"]
    n_c = Cp // tile_c
    # Split the vocab stream across a leading "parallel" axis (both v7x TensorCores).
    n_p = 2 if (n_c >= 2 and n_c % 2 == 0) else 1
    n_cc = n_c // n_p

    # Glue: embedding gather (data-dependent row lookup) stays in XLA for now.
    embedded = jnp.take(params["emb"], token_ids, axis=0)          # [B, Hp] f32
    h0 = jnp.pad(hidden[0], ((0, 0), (0, Hp - H)))                 # [B, Hp] f32

    # VMEM budget (accounts for single vs. double buffering of the constant inputs,
    # double-buffered streamed w_lin/b_lin/logit tiles, resident outputs and scratch).
    cbuf = 1 if single_buffer else 2
    need = (
        cbuf * (2 * B * Hp * 4)                     # embedded + h0
        + cbuf * (2 * Hp * 3 * Hp * 2)              # fused GRU weights (bf16)
        + cbuf * (3 * Hp * 4 + Hp * 4)              # fused GRU biases
        + 2 * (Hp * tile_c * 2 + tile_c * 4)        # streamed w_lin / b_lin tiles
        + 2 * (B * tile_c * 4)                      # streamed raw-logit output tiles
        + n_p * (B * Hp * 4 + B * 4)                # resident hnew / lse outputs
        + B * Hp * 2 + 2 * B * 4                    # scratch (hbf, m, s)
    )
    # Cap well below v7x's 64 MiB physical VMEM (harmless on v5e/v6e's 128 MiB).
    vmem_limit = int(min(56 * 1024 * 1024, max(16 * 1024 * 1024, 2 * need)))

    grid_spec = pltpu.PrefetchScalarGridSpec(
        num_scalar_prefetch=0,
        grid=(n_p, n_cc),
        in_specs=[
            _const_spec((B, Hp), single_buffer),            # embedded
            _const_spec((B, Hp), single_buffer),            # h0
            _const_spec((Hp, 3 * Hp), single_buffer),       # w_i (fused GRU input weights)
            _const_spec((Hp, 3 * Hp), single_buffer),       # w_h (fused GRU hidden weights)
            _const_spec((1, 3 * Hp), single_buffer),        # b_i
            _const_spec((1, Hp), single_buffer),            # b_hn
            pl.BlockSpec((Hp, tile_c), lambda p, c: (0, p * n_cc + c)),   # w_lin tile
            pl.BlockSpec((1, tile_c), lambda p, c: (0, p * n_cc + c)),    # b_lin tile
        ],
        out_specs=(
            # Raw-logit tile streams out every grid step (lane-dense, pipelined writeback).
            pl.BlockSpec((1, B, tile_c), lambda p, c: (p * n_cc + c, 0, 0)),
            # Per-partition partial logsumexp (written on the last tile of the partition).
            pl.BlockSpec((1, B, 1), lambda p, c: (p, 0, 0)),
            # New hidden state (computed on the first tile of each partition).
            pl.BlockSpec((1, B, Hp), lambda p, c: (p, 0, 0)),
        ),
        scratch_shapes=[
            pltpu.VMEM((B, Hp), jnp.bfloat16),   # h_new (bf16) for the Linear matmuls
            pltpu.VMEM((B, 1), jnp.float32),     # running max
            pltpu.VMEM((B, 1), jnp.float32),     # running sum-exp
        ],
    )

    out_tiles, lse_p, hnew_p = pl.pallas_call(
        decoder_rnn_kernel,
        out_shape=(
            jax.ShapeDtypeStruct((n_c, B, tile_c), jnp.float32),
            jax.ShapeDtypeStruct((n_p, B, 1), jnp.float32),
            jax.ShapeDtypeStruct((n_p, B, Hp), jnp.float32),
        ),
        grid_spec=grid_spec,
        compiler_params=pltpu.CompilerParams(
            dimension_semantics=("parallel", "arbitrary"),
            vmem_limit_bytes=vmem_limit,
        ),
    )(embedded, h0, params["w_i"], params["w_h"], params["b_i"], params["b_hn"],
      params["w_lin"], params["b_lin"])

    # Wrapper: combine per-partition logsumexps, fuse the "- lse" normalization into the
    # (already necessary) tiled-slab -> [B, Cp] layout pass, drop padded classes.
    lse = jax.nn.logsumexp(lse_p, axis=0)                                   # [B, 1]
    log_probs = (jnp.transpose(out_tiles, (1, 0, 2)).reshape(B, Cp) - lse)[:, :C]
    h_new = hnew_p[0, :, :H][None, :, :]
    return log_probs, h_new


def reference_forward(token_ids, hidden, raw):
    """Pure-JAX f32 reference mirroring the PyTorch forward."""
    x = jnp.maximum(jnp.take(raw["emb"], token_ids, axis=0), 0.0)
    h = hidden[0]
    r = jax.nn.sigmoid(x @ raw["w_ir"] + raw["b_ir"] + h @ raw["w_hr"] + raw["b_hr"])
    z = jax.nn.sigmoid(x @ raw["w_iz"] + raw["b_iz"] + h @ raw["w_hz"] + raw["b_hz"])
    n = jnp.tanh(x @ raw["w_in"] + raw["b_in"] + r * (h @ raw["w_hn"] + raw["b_hn"]))
    h_new = (1.0 - z) * n + z * h
    logits = h_new @ raw["w_lin"] + raw["b_lin"]
    return jax.nn.log_softmax(logits, axis=1), h_new[None]


def run_case(hidden_size, output_classes, batch, tile_c_max, key):
    k_params, k_tok, k_hid = jax.random.split(key, 3)
    raw = init_params(k_params, hidden_size, output_classes)
    packed = pack_params(raw, tile_c_max=tile_c_max)

    token_ids = jax.random.randint(k_tok, (batch,), 0, output_classes, dtype=jnp.int32)
    hidden = jax.random.normal(k_hid, (1, batch, hidden_size), jnp.float32)

    def call(single_buffer):
        fwd = jax.jit(functools.partial(decoder_rnn_forward, params=packed,
                                        single_buffer=single_buffer))
        return jax.block_until_ready(fwd(token_ids, hidden))

    try:
        log_probs, h_new = call(True)
    except Exception:
        # pipeline_mode=pl.Buffered(1) not supported by this JAX/Mosaic build; fall back
        # to default double-buffering (correctness unaffected).
        log_probs, h_new = call(False)

    ref_lp, ref_h = reference_forward(token_ids, hidden, raw)
    assert log_probs.shape == (batch, output_classes)
    assert h_new.shape == (1, batch, hidden_size)
    # bf16 matmul weights vs. the f32 reference -> loosened tolerance.
    assert jnp.allclose(log_probs, ref_lp, atol=5e-2, rtol=5e-2), "log_probs mismatch"
    assert jnp.allclose(h_new, ref_h, atol=5e-2, rtol=5e-2), "hidden mismatch"


if __name__ == "__main__":
    key = jax.random.PRNGKey(0)
    k1, k2 = jax.random.split(key)

    # Small config from the module spec: single vocab tile, no partition split.
    run_case(hidden_size=32, output_classes=16, batch=8, tile_c_max=TILE_C_MAX, key=k1)

    # Multi-tile config (forced small tile) to exercise the streamed per-tile output,
    # the online logsumexp, and the 2-way vocab partition ("parallel" axis) path.
    run_case(hidden_size=32, output_classes=512, batch=8, tile_c_max=128, key=k2)

    print("KERNEL_OK")
</pallas_src>

<mosaic_0001>
module attributes {stable_mosaic.version = 11 : i64} {
  func.func @decoder_rnn_kernel(%arg0: i32, %arg1: i32, %arg2: memref<8x128xf32, #tpu.memory_space<vmem>>, %arg3: memref<8x128xf32, #tpu.memory_space<vmem>>, %arg4: memref<128x384xbf16, #tpu.memory_space<vmem>>, %arg5: memref<128x384xbf16, #tpu.memory_space<vmem>>, %arg6: memref<1x384xf32, #tpu.memory_space<vmem>>, %arg7: memref<1x128xf32, #tpu.memory_space<vmem>>, %arg8: memref<128x128xbf16, #tpu.memory_space<vmem>>, %arg9: memref<1x128xf32, #tpu.memory_space<vmem>>, %arg10: memref<1x8x128xf32, #tpu.memory_space<vmem>>, %arg11: memref<1x8x1xf32, #tpu.memory_space<vmem>>, %arg12: memref<1x8x128xf32, #tpu.memory_space<vmem>>, %arg13: memref<8x128xbf16, #tpu.memory_space<vmem>>, %arg14: memref<8x1xf32, #tpu.memory_space<vmem>>, %arg15: memref<8x1xf32, #tpu.memory_space<vmem>>) attributes {dimension_semantics = [#tpu.dimension_semantics<parallel>, #tpu.dimension_semantics<arbitrary>], iteration_bounds = array<i64: 1, 1>, scalar_prefetch = 0 : i64, scratch_operands = 3 : i64, tpu.core_type = #tpu.core_type<tc>, window_params = [{pipeline_mode = #tpu.pipeline_mode<synchronous>, transform_indices = @transform_0, window_bounds = array<i64: 8, 128>}, {pipeline_mode = #tpu.pipeline_mode<synchronous>, transform_indices = @transform_1, window_bounds = array<i64: 8, 128>}, {pipeline_mode = #tpu.pipeline_mode<synchronous>, transform_indices = @transform_2, window_bounds = array<i64: 128, 384>}, {pipeline_mode = #tpu.pipeline_mode<synchronous>, transform_indices = @transform_3, window_bounds = array<i64: 128, 384>}, {pipeline_mode = #tpu.pipeline_mode<synchronous>, transform_indices = @transform_4, window_bounds = array<i64: 1, 384>}, {pipeline_mode = #tpu.pipeline_mode<synchronous>, transform_indices = @transform_5, window_bounds = array<i64: 1, 128>}, {transform_indices = @transform_6, window_bounds = array<i64: 128, 128>}, {transform_indices = @transform_7, window_bounds = array<i64: 1, 128>}, {transform_indices = @transform_8, window_bounds = array<i64: 1, 8, 128>}, {transform_indices = @transform_9, window_bounds = array<i64: 1, 8, 1>}, {transform_indices = @transform_10, window_bounds = array<i64: 1, 8, 128>}]} {
    %c0_i32 = arith.constant 0 : i32
    %0 = arith.cmpi eq, %arg1, %c0_i32 : i32
    %1 = arith.extui %0 : i1 to i32
    %c0_i32_0 = arith.constant 0 : i32
    %2 = arith.cmpi ne, %1, %c0_i32_0 : i32
    scf.if %2 {
      %c0_21 = arith.constant 0 : index
      %c0_22 = arith.constant 0 : index
      %31 = vector.load %arg2[%c0_21, %c0_22] : memref<8x128xf32, #tpu.memory_space<vmem>>, vector<8x128xf32>
      %cst_23 = arith.constant 0.000000e+00 : f32
      %32 = vector.broadcast %cst_23 : f32 to vector<8x128xf32>
      %33 = arith.maximumf %31, %32 : vector<8x128xf32>
      %34 = arith.truncf %33 : vector<8x128xf32> to vector<8x128xbf16>
      %c0_24 = arith.constant 0 : index
      %c0_25 = arith.constant 0 : index
      %35 = vector.load %arg3[%c0_24, %c0_25] : memref<8x128xf32, #tpu.memory_space<vmem>>, vector<8x128xf32>
      %c0_26 = arith.constant 0 : index
      %c0_27 = arith.constant 0 : index
      %36 = vector.load %arg4[%c0_26, %c0_27] : memref<128x384xbf16, #tpu.memory_space<vmem>>, vector<128x384xbf16>
      %cst_28 = arith.constant dense<0.000000e+00> : vector<8x384xf32>
      %37 = tpu.matmul %34, %36, %cst_28 {dimension_numbers = #tpu.dot_dimension_numbers<[1], [0], [0], [1], [0, 0, 1, 1], [], []>} : vector<8x128xbf16>, vector<128x384xbf16>, vector<8x384xf32> -> vector<8x384xf32>
      %c0_29 = arith.constant 0 : index
      %c0_30 = arith.constant 0 : index
      %38 = vector.load %arg6[%c0_29, %c0_30] : memref<1x384xf32, #tpu.memory_space<vmem>>, vector<1x384xf32>
      %39 = vector.broadcast %38 : vector<1x384xf32> to vector<8x384xf32>
      %40 = arith.addf %37, %39 : vector<8x384xf32>
      %41 = arith.truncf %35 : vector<8x128xf32> to vector<8x128xbf16>
      %c0_31 = arith.constant 0 : index
      %c0_32 = arith.constant 0 : index
      %42 = vector.load %arg5[%c0_31, %c0_32] : memref<128x384xbf16, #tpu.memory_space<vmem>>, vector<128x384xbf16>
      %cst_33 = arith.constant dense<0.000000e+00> : vector<8x384xf32>
      %43 = tpu.matmul %41, %42, %cst_33 {dimension_numbers = #tpu.dot_dimension_numbers<[1], [0], [0], [1], [0, 0, 1, 1], [], []>} : vector<8x128xbf16>, vector<128x384xbf16>, vector<8x384xf32> -> vector<8x384xf32>
      %44 = vector.extract_strided_slice %40 {offsets = [0, 0], sizes = [8, 128], strides = [1, 1]} : vector<8x384xf32> to vector<8x128xf32>
      %45 = vector.extract_strided_slice %43 {offsets = [0, 0], sizes = [8, 128], strides = [1, 1]} : vector<8x384xf32> to vector<8x128xf32>
      %46 = arith.addf %44, %45 : vector<8x128xf32>
      %47 = arith.negf %46 : vector<8x128xf32>
      %48 = math.exp %47 : vector<8x128xf32>
      %cst_34 = arith.constant 1.000000e+00 : f32
      %49 = vector.broadcast %cst_34 : f32 to vector<8x128xf32>
      %50 = arith.addf %49, %48 : vector<8x128xf32>
      %51 = arith.divf %49, %50 : vector<8x128xf32>
      %52 = vector.extract_strided_slice %40 {offsets = [0, 128], sizes = [8, 128], strides = [1, 1]} : vector<8x384xf32> to vector<8x128xf32>
      %53 = vector.extract_strided_slice %43 {offsets = [0, 128], sizes = [8, 128], strides = [1, 1]} : vector<8x384xf32> to vector<8x128xf32>
      %54 = arith.addf %52, %53 : vector<8x128xf32>
      %55 = arith.negf %54 : vector<8x128xf32>
      %56 = math.exp %55 : vector<8x128xf32>
      %cst_35 = arith.constant 1.000000e+00 : f32
      %57 = vector.broadcast %cst_35 : f32 to vector<8x128xf32>
      %58 = arith.addf %57, %56 : vector<8x128xf32>
      %59 = arith.divf %57, %58 : vector<8x128xf32>
      %60 = vector.extract_strided_slice %40 {offsets = [0, 256], sizes = [8, 128], strides = [1, 1]} : vector<8x384xf32> to vector<8x128xf32>
      %61 = vector.extract_strided_slice %43 {offsets = [0, 256], sizes = [8, 128], strides = [1, 1]} : vector<8x384xf32> to vector<8x128xf32>
      %c0_36 = arith.constant 0 : index
      %c0_37 = arith.constant 0 : index
      %62 = vector.load %arg7[%c0_36, %c0_37] : memref<1x128xf32, #tpu.memory_space<vmem>>, vector<1x128xf32>
      %63 = vector.broadcast %62 : vector<1x128xf32> to vector<8x128xf32>
      %64 = arith.addf %61, %63 : vector<8x128xf32>
      %65 = arith.mulf %51, %64 : vector<8x128xf32>
      %66 = arith.addf %60, %65 : vector<8x128xf32>
      %67 = math.tanh %66 : vector<8x128xf32>
      %cst_38 = arith.constant 1.000000e+00 : f32
      %68 = vector.broadcast %cst_38 : f32 to vector<8x128xf32>
      %69 = arith.subf %68, %59 : vector<8x128xf32>
      %70 = arith.mulf %69, %67 : vector<8x128xf32>
      %71 = arith.mulf %59, %35 : vector<8x128xf32>
      %72 = arith.addf %70, %71 : vector<8x128xf32>
      %c0_39 = arith.constant 0 : index
      %c0_40 = arith.constant 0 : index
      %c0_41 = arith.constant 0 : index
      %73 = vector.load %arg12[%c0_39, %c0_40, %c0_41] : memref<1x8x128xf32, #tpu.memory_space<vmem>>, vector<1x8x128xf32>
      %74 = vector.shape_cast %73 : vector<1x8x128xf32> to vector<8x128xf32>
      %75 = vector.shape_cast %72 : vector<8x128xf32> to vector<1x8x128xf32>
      tpu.vector_store %arg12[%c0_39, %c0_40, %c0_41], %75 {strides = array<i32>} : memref<1x8x128xf32, #tpu.memory_space<vmem>>, vector<1x8x128xf32>,
      %76 = arith.truncf %72 : vector<8x128xf32> to vector<8x128xbf16>
      %c0_42 = arith.constant 0 : index
      %c0_43 = arith.constant 0 : index
      %77 = vector.load %arg13[%c0_42, %c0_43] : memref<8x128xbf16, #tpu.memory_space<vmem>>, vector<8x128xbf16>
      tpu.vector_store %arg13[%c0_42, %c0_43], %76 {strides = array<i32>} : memref<8x128xbf16, #tpu.memory_space<vmem>>, vector<8x128xbf16>,
      %cst_44 = arith.constant 0xFF800000 : f32
      %78 = vector.broadcast %cst_44 : f32 to vector<8x1xf32>
      %c0_45 = arith.constant 0 : index
      %c0_46 = arith.constant 0 : index
      %79 = vector.load %arg14[%c0_45, %c0_46] : memref<8x1xf32, #tpu.memory_space<vmem>>, vector<8x1xf32>
      tpu.vector_store %arg14[%c0_45, %c0_46], %78 {strides = array<i32>} : memref<8x1xf32, #tpu.memory_space<vmem>>, vector<8x1xf32>,
      %cst_47 = arith.constant 0.000000e+00 : f32
      %80 = vector.broadcast %cst_47 : f32 to vector<8x1xf32>
      %c0_48 = arith.constant 0 : index
      %c0_49 = arith.constant 0 : index
      %81 = vector.load %arg15[%c0_48, %c0_49] : memref<8x1xf32, #tpu.memory_space<vmem>>, vector<8x1xf32>
      tpu.vector_store %arg15[%c0_48, %c0_49], %80 {strides = array<i32>} : memref<8x1xf32, #tpu.memory_space<vmem>>, vector<8x1xf32>,
    } else {
    }
    %c0 = arith.constant 0 : index
    %c0_1 = arith.constant 0 : index
    %3 = vector.load %arg13[%c0, %c0_1] : memref<8x128xbf16, #tpu.memory_space<vmem>>, vector<8x128xbf16>
    %c0_2 = arith.constant 0 : index
    %c0_3 = arith.constant 0 : index
    %4 = vector.load %arg8[%c0_2, %c0_3] : memref<128x128xbf16, #tpu.memory_space<vmem>>, vector<128x128xbf16>
    %cst = arith.constant dense<0.000000e+00> : vector<8x128xf32>
    %5 = tpu.matmul %3, %4, %cst {dimension_numbers = #tpu.dot_dimension_numbers<[1], [0], [0], [1], [0, 0, 1, 1], [], []>} : vector<8x128xbf16>, vector<128x128xbf16>, vector<8x128xf32> -> vector<8x128xf32>
    %c0_4 = arith.constant 0 : index
    %c0_5 = arith.constant 0 : index
    %6 = vector.load %arg9[%c0_4, %c0_5] : memref<1x128xf32, #tpu.memory_space<vmem>>, vector<1x128xf32>
    %7 = vector.broadcast %6 : vector<1x128xf32> to vector<8x128xf32>
    %8 = arith.addf %5, %7 : vector<8x128xf32>
    %c0_6 = arith.constant 0 : index
    %c0_7 = arith.constant 0 : index
    %c0_8 = arith.constant 0 : index
    %9 = vector.load %arg10[%c0_6, %c0_7, %c0_8] : memref<1x8x128xf32, #tpu.memory_space<vmem>>, vector<1x8x128xf32>
    %10 = vector.shape_cast %9 : vector<1x8x128xf32> to vector<8x128xf32>
    %11 = vector.shape_cast %8 : vector<8x128xf32> to vector<1x8x128xf32>
    tpu.vector_store %arg10[%c0_6, %c0_7, %c0_8], %11 {strides = array<i32>} : memref<1x8x128xf32, #tpu.memory_space<vmem>>, vector<1x8x128xf32>,
    %c0_9 = arith.constant 0 : index
    %c0_10 = arith.constant 0 : index
    %12 = vector.load %arg14[%c0_9, %c0_10] : memref<8x1xf32, #tpu.memory_space<vmem>>, vector<8x1xf32>
    %cst_11 = arith.constant dense<0xFF800000> : vector<8xf32>
    %13 = vector.multi_reduction <maximumf>, %8, %cst_11 [1] : vector<8x128xf32> to vector<8xf32>
    %14 = vector.shape_cast %13 : vector<8xf32> to vector<8x1xf32>
    %15 = arith.maximumf %12, %14 : vector<8x1xf32>
    %c0_12 = arith.constant 0 : index
    %c0_13 = arith.constant 0 : index
    %16 = vector.load %arg15[%c0_12, %c0_13] : memref<8x1xf32, #tpu.memory_space<vmem>>, vector<8x1xf32>
    %17 = arith.subf %12, %15 : vector<8x1xf32>
    %18 = math.exp %17 : vector<8x1xf32>
    %19 = arith.mulf %16, %18 : vector<8x1xf32>
    %20 = vector.broadcast %15 : vector<8x1xf32> to vector<8x128xf32>
    %21 = arith.subf %8, %20 : vector<8x128xf32>
    %22 = math.exp %21 : vector<8x128xf32>
    %cst_14 = arith.constant dense<0.000000e+00> : vector<8xf32>
    %23 = vector.multi_reduction <add>, %22, %cst_14 [1] : vector<8x128xf32> to vector<8xf32>
    %24 = vector.shape_cast %23 : vector<8xf32> to vector<8x1xf32>
    %25 = arith.addf %19, %24 : vector<8x1xf32>
    %c0_15 = arith.constant 0 : index
    %c0_16 = arith.constant 0 : index
    %26 = vector.load %arg15[%c0_15, %c0_16] : memref<8x1xf32, #tpu.memory_space<vmem>>, vector<8x1xf32>
    tpu.vector_store %arg15[%c0_15, %c0_16], %25 {strides = array<i32>} : memref<8x1xf32, #tpu.memory_space<vmem>>, vector<8x1xf32>,
    %c0_17 = arith.constant 0 : index
    %c0_18 = arith.constant 0 : index
    %27 = vector.load %arg14[%c0_17, %c0_18] : memref<8x1xf32, #tpu.memory_space<vmem>>, vector<8x1xf32>
    tpu.vector_store %arg14[%c0_17, %c0_18], %15 {strides = array<i32>} : memref<8x1xf32, #tpu.memory_space<vmem>>, vector<8x1xf32>,
    %c0_i32_19 = arith.constant 0 : i32
    %28 = arith.cmpi eq, %arg1, %c0_i32_19 : i32
    %29 = arith.extui %28 : i1 to i32
    %c0_i32_20 = arith.constant 0 : i32
    %30 = arith.cmpi ne, %29, %c0_i32_20 : i32
    scf.if %30 {
      %c0_21 = arith.constant 0 : index
      %c0_22 = arith.constant 0 : index
      %31 = vector.load %arg14[%c0_21, %c0_22] : memref<8x1xf32, #tpu.memory_space<vmem>>, vector<8x1xf32>
      %c0_23 = arith.constant 0 : index
      %c0_24 = arith.constant 0 : index
      %32 = vector.load %arg15[%c0_23, %c0_24] : memref<8x1xf32, #tpu.memory_space<vmem>>, vector<8x1xf32>
      %33 = math.log %32 : vector<8x1xf32>
      %34 = arith.addf %31, %33 : vector<8x1xf32>
      %c0_25 = arith.constant 0 : index
      %c0_26 = arith.constant 0 : index
      %c0_27 = arith.constant 0 : index
      %35 = vector.load %arg11[%c0_25, %c0_26, %c0_27] : memref<1x8x1xf32, #tpu.memory_space<vmem>>, vector<1x8x1xf32>
      %36 = vector.shape_cast %35 : vector<1x8x1xf32> to vector<8x1xf32>
      %37 = vector.shape_cast %34 : vector<8x1xf32> to vector<1x8x1xf32>
      tpu.vector_store %arg11[%c0_25, %c0_26, %c0_27], %37 {strides = array<i32>} : memref<1x8x1xf32, #tpu.memory_space<vmem>>, vector<1x8x1xf32>,
    } else {
    }
    return
  }
  func.func @transform_0(%arg0: i32, %arg1: i32) -> (i32, i32) {
    %c0_i32 = arith.constant 0 : i32
    %c0_i32_0 = arith.constant 0 : i32
    %c0_i32_1 = arith.constant 0 : i32
    return %c0_i32, %c0_i32_0 : i32, i32
  }
  func.func @transform_1(%arg0: i32, %arg1: i32) -> (i32, i32) {
    %c0_i32 = arith.constant 0 : i32
    %c0_i32_0 = arith.constant 0 : i32
    %c0_i32_1 = arith.constant 0 : i32
    return %c0_i32, %c0_i32_0 : i32, i32
  }
  func.func @transform_2(%arg0: i32, %arg1: i32) -> (i32, i32) {
    %c0_i32 = arith.constant 0 : i32
    %c0_i32_0 = arith.constant 0 : i32
    %c0_i32_1 = arith.constant 0 : i32
    return %c0_i32, %c0_i32_0 : i32, i32
  }
  func.func @transform_3(%arg0: i32, %arg1: i32) -> (i32, i32) {
    %c0_i32 = arith.constant 0 : i32
    %c0_i32_0 = arith.constant 0 : i32
    %c0_i32_1 = arith.constant 0 : i32
    return %c0_i32, %c0_i32_0 : i32, i32
  }
  func.func @transform_4(%arg0: i32, %arg1: i32) -> (i32, i32) {
    %c0_i32 = arith.constant 0 : i32
    %c0_i32_0 = arith.constant 0 : i32
    %c0_i32_1 = arith.constant 0 : i32
    return %c0_i32, %c0_i32_0 : i32, i32
  }
  func.func @transform_5(%arg0: i32, %arg1: i32) -> (i32, i32) {
    %c0_i32 = arith.constant 0 : i32
    %c0_i32_0 = arith.constant 0 : i32
    %c0_i32_1 = arith.constant 0 : i32
    return %c0_i32, %c0_i32_0 : i32, i32
  }
  func.func @transform_6(%arg0: i32, %arg1: i32) -> (i32, i32) {
    %c1_i32 = arith.constant 1 : i32
    %0 = arith.muli %arg0, %c1_i32 : i32
    %1 = arith.addi %0, %arg1 : i32
    %c0_i32 = arith.constant 0 : i32
    %c0_i32_0 = arith.constant 0 : i32
    return %c0_i32, %1 : i32, i32
  }
  func.func @transform_7(%arg0: i32, %arg1: i32) -> (i32, i32) {
    %c1_i32 = arith.constant 1 : i32
    %0 = arith.muli %arg0, %c1_i32 : i32
    %1 = arith.addi %0, %arg1 : i32
    %c0_i32 = arith.constant 0 : i32
    %c0_i32_0 = arith.constant 0 : i32
    return %c0_i32, %1 : i32, i32
  }
  func.func @transform_8(%arg0: i32, %arg1: i32) -> (i32, i32, i32) {
    %c1_i32 = arith.constant 1 : i32
    %0 = arith.muli %arg0, %c1_i32 : i32
    %1 = arith.addi %0, %arg1 : i32
    %c0_i32 = arith.constant 0 : i32
    %c0_i32_0 = arith.constant 0 : i32
    %c0_i32_1 = arith.constant 0 : i32
    return %1, %c0_i32, %c0_i32_0 : i32, i32, i32
  }
  func.func @transform_9(%arg0: i32, %arg1: i32) -> (i32, i32, i32) {
    %c0_i32 = arith.constant 0 : i32
    %c0_i32_0 = arith.constant 0 : i32
    %c0_i32_1 = arith.constant 0 : i32
    return %arg0, %c0_i32, %c0_i32_0 : i32, i32, i32
  }
  func.func @transform_10(%arg0: i32, %arg1: i32) -> (i32, i32, i32) {
    %c0_i32 = arith.constant 0 : i32
    %c0_i32_0 = arith.constant 0 : i32
    %c0_i32_1 = arith.constant 0 : i32
    return %arg0, %c0_i32, %c0_i32_0 : i32, i32, i32
  }
}

module attributes {stable_mosaic.version = 11 : i64} {
  func.func @decoder_rnn_kernel(%arg0: i32, %arg1: i32, %arg2: memref<8x128xf32, #tpu.memory_space<vmem>>, %arg3: memref<8x128xf32, #tpu.memory_space<vmem>>, %arg4: memref<128x384xbf16, #tpu.memory_space<vmem>>, %arg5: memref<128x384xbf16, #tpu.memory_space<vmem>>, %arg6: memref<1x384xf32, #tpu.memory_space<vmem>>, %arg7: memref<1x128xf32, #tpu.memory_space<vmem>>, %arg8: memref<128x128xbf16, #tpu.memory_space<vmem>>, %arg9: memref<1x128xf32, #tpu.memory_space<vmem>>, %arg10: memref<1x8x128xf32, #tpu.memory_space<vmem>>, %arg11: memref<1x8x1xf32, #tpu.memory_space<vmem>>, %arg12: memref<1x8x128xf32, #tpu.memory_space<vmem>>, %arg13: memref<8x128xbf16, #tpu.memory_space<vmem>>, %arg14: memref<8x1xf32, #tpu.memory_space<vmem>>, %arg15: memref<8x1xf32, #tpu.memory_space<vmem>>) attributes {dimension_semantics = [#tpu.dimension_semantics<parallel>, #tpu.dimension_semantics<arbitrary>], iteration_bounds = array<i64: 1, 1>, scalar_prefetch = 0 : i64, scratch_operands = 3 : i64, tpu.core_type = #tpu.core_type<tc>, window_params = [{pipeline_mode = #tpu.pipeline_mode<synchronous>, transform_indices = @transform_0, window_bounds = array<i64: 8, 128>}, {pipeline_mode = #tpu.pipeline_mode<synchronous>, transform_indices = @transform_1, window_bounds = array<i64: 8, 128>}, {pipeline_mode = #tpu.pipeline_mode<synchronous>, transform_indices = @transform_2, window_bounds = array<i64: 128, 384>}, {pipeline_mode = #tpu.pipeline_mode<synchronous>, transform_indices = @transform_3, window_bounds = array<i64: 128, 384>}, {pipeline_mode = #tpu.pipeline_mode<synchronous>, transform_indices = @transform_4, window_bounds = array<i64: 1, 384>}, {pipeline_mode = #tpu.pipeline_mode<synchronous>, transform_indices = @transform_5, window_bounds = array<i64: 1, 128>}, {transform_indices = @transform_6, window_bounds = array<i64: 128, 128>}, {transform_indices = @transform_7, window_bounds = array<i64: 1, 128>}, {transform_indices = @transform_8, window_bounds = array<i64: 1, 8, 128>}, {transform_indices = @transform_9, window_bounds = array<i64: 1, 8, 1>}, {transform_indices = @transform_10, window_bounds = array<i64: 1, 8, 128>}]} {
    %c0_i32 = arith.constant 0 : i32
    %0 = arith.cmpi eq, %arg1, %c0_i32 : i32
    %1 = arith.extui %0 : i1 to i32
    %c0_i32_0 = arith.constant 0 : i32
    %2 = arith.cmpi ne, %1, %c0_i32_0 : i32
    scf.if %2 {
      %c0_21 = arith.constant 0 : index
      %c0_22 = arith.constant 0 : index
      %31 = vector.load %arg2[%c0_21, %c0_22] : memref<8x128xf32, #tpu.memory_space<vmem>>, vector<8x128xf32>
      %cst_23 = arith.constant 0.000000e+00 : f32
      %32 = vector.broadcast %cst_23 : f32 to vector<8x128xf32>
      %33 = arith.maximumf %31, %32 : vector<8x128xf32>
      %34 = arith.truncf %33 : vector<8x128xf32> to vector<8x128xbf16>
      %c0_24 = arith.constant 0 : index
      %c0_25 = arith.constant 0 : index
      %35 = vector.load %arg3[%c0_24, %c0_25] : memref<8x128xf32, #tpu.memory_space<vmem>>, vector<8x128xf32>
      %c0_26 = arith.constant 0 : index
      %c0_27 = arith.constant 0 : index
      %36 = vector.load %arg4[%c0_26, %c0_27] : memref<128x384xbf16, #tpu.memory_space<vmem>>, vector<128x384xbf16>
      %cst_28 = arith.constant dense<0.000000e+00> : vector<8x384xf32>
      %37 = tpu.matmul %34, %36, %cst_28 {dimension_numbers = #tpu.dot_dimension_numbers<[1], [0], [0], [1], [0, 0, 1, 1], [], []>} : vector<8x128xbf16>, vector<128x384xbf16>, vector<8x384xf32> -> vector<8x384xf32>
      %c0_29 = arith.constant 0 : index
      %c0_30 = arith.constant 0 : index
      %38 = vector.load %arg6[%c0_29, %c0_30] : memref<1x384xf32, #tpu.memory_space<vmem>>, vector<1x384xf32>
      %39 = vector.broadcast %38 : vector<1x384xf32> to vector<8x384xf32>
      %40 = arith.addf %37, %39 : vector<8x384xf32>
      %41 = arith.truncf %35 : vector<8x128xf32> to vector<8x128xbf16>
      %c0_31 = arith.constant 0 : index
      %c0_32 = arith.constant 0 : index
      %42 = vector.load %arg5[%c0_31, %c0_32] : memref<128x384xbf16, #tpu.memory_space<vmem>>, vector<128x384xbf16>
      %cst_33 = arith.constant dense<0.000000e+00> : vector<8x384xf32>
      %43 = tpu.matmul %41, %42, %cst_33 {dimension_numbers = #tpu.dot_dimension_numbers<[1], [0], [0], [1], [0, 0, 1, 1], [], []>} : vector<8x128xbf16>, vector<128x384xbf16>, vector<8x384xf32> -> vector<8x384xf32>
      %44 = vector.extract_strided_slice %40 {offsets = [0, 0], sizes = [8, 128], strides = [1, 1]} : vector<8x384xf32> to vector<8x128xf32>
      %45 = vector.extract_strided_slice %43 {offsets = [0, 0], sizes = [8, 128], strides = [1, 1]} : vector<8x384xf32> to vector<8x128xf32>
      %46 = arith.addf %44, %45 : vector<8x128xf32>
      %47 = arith.negf %46 : vector<8x128xf32>
      %48 = math.exp %47 : vector<8x128xf32>
      %cst_34 = arith.constant 1.000000e+00 : f32
      %49 = vector.broadcast %cst_34 : f32 to vector<8x128xf32>
      %50 = arith.addf %49, %48 : vector<8x128xf32>
      %51 = arith.divf %49, %50 : vector<8x128xf32>
      %52 = vector.extract_strided_slice %40 {offsets = [0, 128], sizes = [8, 128], strides = [1, 1]} : vector<8x384xf32> to vector<8x128xf32>
      %53 = vector.extract_strided_slice %43 {offsets = [0, 128], sizes = [8, 128], strides = [1, 1]} : vector<8x384xf32> to vector<8x128xf32>
      %54 = arith.addf %52, %53 : vector<8x128xf32>
      %55 = arith.negf %54 : vector<8x128xf32>
      %56 = math.exp %55 : vector<8x128xf32>
      %cst_35 = arith.constant 1.000000e+00 : f32
      %57 = vector.broadcast %cst_35 : f32 to vector<8x128xf32>
      %58 = arith.addf %57, %56 : vector<8x128xf32>
      %59 = arith.divf %57, %58 : vector<8x128xf32>
      %60 = vector.extract_strided_slice %40 {offsets = [0, 256], sizes = [8, 128], strides = [1, 1]} : vector<8x384xf32> to vector<8x128xf32>
      %61 = vector.extract_strided_slice %43 {offsets = [0, 256], sizes = [8, 128], strides = [1, 1]} : vector<8x384xf32> to vector<8x128xf32>
      %c0_36 = arith.constant 0 : index
      %c0_37 = arith.constant 0 : index
      %62 = vector.load %arg7[%c0_36, %c0_37] : memref<1x128xf32, #tpu.memory_space<vmem>>, vector<1x128xf32>
      %63 = vector.broadcast %62 : vector<1x128xf32> to vector<8x128xf32>
      %64 = arith.addf %61, %63 : vector<8x128xf32>
      %65 = arith.mulf %51, %64 : vector<8x128xf32>
      %66 = arith.addf %60, %65 : vector<8x128xf32>
      %67 = math.tanh %66 : vector<8x128xf32>
      %cst_38 = arith.constant 1.000000e+00 : f32
      %68 = vector.broadcast %cst_38 : f32 to vector<8x128xf32>
      %69 = arith.subf %68, %59 : vector<8x128xf32>
      %70 = arith.mulf %69, %67 : vector<8x128xf32>
      %71 = arith.mulf %59, %35 : vector<8x128xf32>
      %72 = arith.addf %70, %71 : vector<8x128xf32>
      %c0_39 = arith.constant 0 : index
      %c0_40 = arith.constant 0 : index
      %c0_41 = arith.constant 0 : index
      %73 = vector.load %arg12[%c0_39, %c0_40, %c0_41] : memref<1x8x128xf32, #tpu.memory_space<vmem>>, vector<1x8x128xf32>
      %74 = vector.shape_cast %73 : vector<1x8x128xf32> to vector<8x128xf32>
      %75 = vector.shape_cast %72 : vector<8x128xf32> to vector<1x8x128xf32>
      tpu.vector_store %arg12[%c0_39, %c0_40, %c0_41], %75 {strides = array<i32>} : memref<1x8x128xf32, #tpu.memory_space<vmem>>, vector<1x8x128xf32>,
      %76 = arith.truncf %72 : vector<8x128xf32> to vector<8x128xbf16>
      %c0_42 = arith.constant 0 : index
      %c0_43 = arith.constant 0 : index
      %77 = vector.load %arg13[%c0_42, %c0_43] : memref<8x128xbf16, #tpu.memory_space<vmem>>, vector<8x128xbf16>
      tpu.vector_store %arg13[%c0_42, %c0_43], %76 {strides = array<i32>} : memref<8x128xbf16, #tpu.memory_space<vmem>>, vector<8x128xbf16>,
      %cst_44 = arith.constant 0xFF800000 : f32
      %78 = vector.broadcast %cst_44 : f32 to vector<8x1xf32>
      %c0_45 = arith.constant 0 : index
      %c0_46 = arith.constant 0 : index
      %79 = vector.load %arg14[%c0_45, %c0_46] : memref<8x1xf32, #tpu.memory_space<vmem>>, vector<8x1xf32>
      tpu.vector_store %arg14[%c0_45, %c0_46], %78 {strides = array<i32>} : memref<8x1xf32, #tpu.memory_space<vmem>>, vector<8x1xf32>,
      %cst_47 = arith.constant 0.000000e+00 : f32
      %80 = vector.broadcast %cst_47 : f32 to vector<8x1xf32>
      %c0_48 = arith.constant 0 : index
      %c0_49 = arith.constant 0 : index
      %81 = vector.load %arg15[%c0_48, %c0_49] : memref<8x1xf32, #tpu.memory_space<vmem>>, vector<8x1xf32>
      tpu.vector_store %arg15[%c0_48, %c0_49], %80 {strides = array<i32>} : memref<8x1xf32, #tpu.memory_space<vmem>>, vector<8x1xf32>,
    } else {
    }
    %c0 = arith.constant 0 : index
    %c0_1 = arith.constant 0 : index
    %3 = vector.load %arg13[%c0, %c0_1] : memref<8x128xbf16, #tpu.memory_space<vmem>>, vector<8x128xbf16>
    %c0_2 = arith.constant 0 : index
    %c0_3 = arith.constant 0 : index
    %4 = vector.load %arg8[%c0_2, %c0_3] : memref<128x128xbf16, #tpu.memory_space<vmem>>, vector<128x128xbf16>
    %cst = arith.constant dense<0.000000e+00> : vector<8x128xf32>
    %5 = tpu.matmul %3, %4, %cst {dimension_numbers = #tpu.dot_dimension_numbers<[1], [0], [0], [1], [0, 0, 1, 1], [], []>} : vector<8x128xbf16>, vector<128x128xbf16>, vector<8x128xf32> -> vector<8x128xf32>
    %c0_4 = arith.constant 0 : index
    %c0_5 = arith.constant 0 : index
    %6 = vector.load %arg9[%c0_4, %c0_5] : memref<1x128xf32, #tpu.memory_space<vmem>>, vector<1x128xf32>
    %7 = vector.broadcast %6 : vector<1x128xf32> to vector<8x128xf32>
    %8 = arith.addf %5, %7 : vector<8x128xf32>
    %c0_6 = arith.constant 0 : index
    %c0_7 = arith.constant 0 : index
    %c0_8 = arith.constant 0 : index
    %9 = vector.load %arg10[%c0_6, %c0_7, %c0_8] : memref<1x8x128xf32, #tpu.memory_space<vmem>>, vector<1x8x128xf32>
    %10 = vector.shape_cast %9 : vector<1x8x128xf32> to vector<8x128xf32>
    %11 = vector.shape_cast %8 : vector<8x128xf32> to vector<1x8x128xf32>
    tpu.vector_store %arg10[%c0_6, %c0_7, %c0_8], %11 {strides = array<i32>} : memref<1x8x128xf32, #tpu.memory_space<vmem>>, vector<1x8x128xf32>,
    %c0_9 = arith.constant 0 : index
    %c0_10 = arith.constant 0 : index
    %12 = vector.load %arg14[%c0_9, %c0_10] : memref<8x1xf32, #tpu.memory_space<vmem>>, vector<8x1xf32>
    %cst_11 = arith.constant dense<0xFF800000> : vector<8xf32>
    %13 = vector.multi_reduction <maximumf>, %8, %cst_11 [1] : vector<8x128xf32> to vector<8xf32>
    %14 = vector.shape_cast %13 : vector<8xf32> to vector<8x1xf32>
    %15 = arith.maximumf %12, %14 : vector<8x1xf32>
    %c0_12 = arith.constant 0 : index
    %c0_13 = arith.constant 0 : index
    %16 = vector.load %arg15[%c0_12, %c0_13] : memref<8x1xf32, #tpu.memory_space<vmem>>, vector<8x1xf32>
    %17 = arith.subf %12, %15 : vector<8x1xf32>
    %18 = math.exp %17 : vector<8x1xf32>
    %19 = arith.mulf %16, %18 : vector<8x1xf32>
    %20 = vector.broadcast %15 : vector<8x1xf32> to vector<8x128xf32>
    %21 = arith.subf %8, %20 : vector<8x128xf32>
    %22 = math.exp %21 : vector<8x128xf32>
    %cst_14 = arith.constant dense<0.000000e+00> : vector<8xf32>
    %23 = vector.multi_reduction <add>, %22, %cst_14 [1] : vector<8x128xf32> to vector<8xf32>
    %24 = vector.shape_cast %23 : vector<8xf32> to vector<8x1xf32>
    %25 = arith.addf %19, %24 : vector<8x1xf32>
    %c0_15 = arith.constant 0 : index
    %c0_16 = arith.constant 0 : index
    %26 = vector.load %arg15[%c0_15, %c0_16] : memref<8x1xf32, #tpu.memory_space<vmem>>, vector<8x1xf32>
    tpu.vector_store %arg15[%c0_15, %c0_16], %25 {strides = array<i32>} : memref<8x1xf32, #tpu.memory_space<vmem>>, vector<8x1xf32>,
    %c0_17 = arith.constant 0 : index
    %c0_18 = arith.constant 0 : index
    %27 = vector.load %arg14[%c0_17, %c0_18] : memref<8x1xf32, #tpu.memory_space<vmem>>, vector<8x1xf32>
    tpu.vector_store %arg14[%c0_17, %c0_18], %15 {strides = array<i32>} : memref<8x1xf32, #tpu.memory_space<vmem>>, vector<8x1xf32>,
    %c0_i32_19 = arith.constant 0 : i32
    %28 = arith.cmpi eq, %arg1, %c0_i32_19 : i32
    %29 = arith.extui %28 : i1 to i32
    %c0_i32_20 = arith.constant 0 : i32
    %30 = arith.cmpi ne, %29, %c0_i32_20 : i32
    scf.if %30 {
      %c0_21 = arith.constant 0 : index
      %c0_22 = arith.constant 0 : index
      %31 = vector.load %arg14[%c0_21, %c0_22] : memref<8x1xf32, #tpu.memory_space<vmem>>, vector<8x1xf32>
      %c0_23 = arith.constant 0 : index
      %c0_24 = arith.constant 0 : index
      %32 = vector.load %arg15[%c0_23, %c0_24] : memref<8x1xf32, #tpu.memory_space<vmem>>, vector<8x1xf32>
      %33 = math.log %32 : vector<8x1xf32>
      %34 = arith.addf %31, %33 : vector<8x1xf32>
      %c0_25 = arith.constant 0 : index
      %c0_26 = arith.constant 0 : index
      %c0_27 = arith.constant 0 : index
      %35 = vector.load %arg11[%c0_25, %c0_26, %c0_27] : memref<1x8x1xf32, #tpu.memory_space<vmem>>, vector<1x8x1xf32>
      %36 = vector.shape_cast %35 : vector<1x8x1xf32> to vector<8x1xf32>
      %37 = vector.shape_cast %34 : vector<8x1xf32> to vector<1x8x1xf32>
      tpu.vector_store %arg11[%c0_25, %c0_26, %c0_27], %37 {strides = array<i32>} : memref<1x8x1xf32, #tpu.memory_space<vmem>>, vector<1x8x1xf32>,
    } else {
    }
    return
  }
  func.func @transform_0(%arg0: i32, %arg1: i32) -> (i32, i32) {
    %c0_i32 = arith.constant 0 : i32
    %c0_i32_0 = arith.constant 0 : i32
    %c0_i32_1 = arith.constant 0 : i32
    return %c0_i32, %c0_i32_0 : i32, i32
  }
  func.func @transform_1(%arg0: i32, %arg1: i32) -> (i32, i32) {
    %c0_i32 = arith.constant 0 : i32
    %c0_i32_0 = arith.constant 0 : i32
    %c0_i32_1 = arith.constant 0 : i32
    return %c0_i32, %c0_i32_0 : i32, i32
  }
  func.func @transform_2(%arg0: i32, %arg1: i32) -> (i32, i32) {
    %c0_i32 = arith.constant 0 : i32
    %c0_i32_0 = arith.constant 0 : i32
    %c0_i32_1 = arith.constant 0 : i32
    return %c0_i32, %c0_i32_0 : i32, i32
  }
  func.func @transform_3(%arg0: i32, %arg1: i32) -> (i32, i32) {
    %c0_i32 = arith.constant 0 : i32
    %c0_i32_0 = arith.constant 0 : i32
    %c0_i32_1 = arith.constant 0 : i32
    return %c0_i32, %c0_i32_0 : i32, i32
  }
  func.func @transform_4(%arg0: i32, %arg1: i32) -> (i32, i32) {
    %c0_i32 = arith.constant 0 : i32
    %c0_i32_0 = arith.constant 0 : i32
    %c0_i32_1 = arith.constant 0 : i32
    return %c0_i32, %c0_i32_0 : i32, i32
  }
  func.func @transform_5(%arg0: i32, %arg1: i32) -> (i32, i32) {
    %c0_i32 = arith.constant 0 : i32
    %c0_i32_0 = arith.constant 0 : i32
    %c0_i32_1 = arith.constant 0 : i32
    return %c0_i32, %c0_i32_0 : i32, i32
  }
  func.func @transform_6(%arg0: i32, %arg1: i32) -> (i32, i32) {
    %c1_i32 = arith.constant 1 : i32
    %0 = arith.muli %arg0, %c1_i32 : i32
    %1 = arith.addi %0, %arg1 : i32
    %c0_i32 = arith.constant 0 : i32
    %c0_i32_0 = arith.constant 0 : i32
    return %c0_i32, %1 : i32, i32
  }
  func.func @transform_7(%arg0: i32, %arg1: i32) -> (i32, i32) {
    %c1_i32 = arith.constant 1 : i32
    %0 = arith.muli %arg0, %c1_i32 : i32
    %1 = arith.addi %0, %arg1 : i32
    %c0_i32 = arith.constant 0 : i32
    %c0_i32_0 = arith.constant 0 : i32
    return %c0_i32, %1 : i32, i32
  }
  func.func @transform_8(%arg0: i32, %arg1: i32) -> (i32, i32, i32) {
    %c1_i32 = arith.constant 1 : i32
    %0 = arith.muli %arg0, %c1_i32 : i32
    %1 = arith.addi %0, %arg1 : i32
    %c0_i32 = arith.constant 0 : i32
    %c0_i32_0 = arith.constant 0 : i32
    %c0_i32_1 = arith.constant 0 : i32
    return %1, %c0_i32, %c0_i32_0 : i32, i32, i32
  }
  func.func @transform_9(%arg0: i32, %arg1: i32) -> (i32, i32, i32) {
    %c0_i32 = arith.constant 0 : i32
    %c0_i32_0 = arith.constant 0 : i32
    %c0_i32_1 = arith.constant 0 : i32
    return %arg0, %c0_i32, %c0_i32_0 : i32, i32, i32
  }
  func.func @transform_10(%arg0: i32, %arg1: i32) -> (i32, i32, i32) {
    %c0_i32 = arith.constant 0 : i32
    %c0_i32_0 = arith.constant 0 : i32
    %c0_i32_1 = arith.constant 0 : i32
    return %arg0, %c0_i32, %c0_i32_0 : i32, i32, i32
  }
}

</mosaic_0001>

<bundles_post_ra>
// kernel: decoder_rnn_forward.1
= control target key start
LH: loop header
LB: loop body
LE: loop exit
PB: predicated region body
PF: predicated region fallthrough
CT: control target
= control target key end

     0   :  { %v1085_v2 = vmov 0.0   ;;  %v1086_v3 = vmov 0   ;;  %vm1087_vm0 = vmmov 0   ;;  %s1390_s0 = inlined_call_operand.vmem [shape: f32[8,128], index: 0, kind: input, shape index: {}]   ;;  %s1391_s1 = inlined_call_operand.vmem [shape: f32[8,128], index: 1, kind: input, shape index: {}]   ;;  %s1392_s2 = inlined_call_operand.vmem [shape: bf16[128,384], index: 2, kind: input, shape index: {}]   ;;  %s1393_s3 = inlined_call_operand.vmem [shape: bf16[128,384], index: 3, kind: input, shape index: {}]   ;;  %s1394_s4 = inlined_call_operand.vmem [shape: f32[1,384], index: 4, kind: input, shape index: {}]   ;;  %s1395_s5 = inlined_call_operand.vmem [shape: f32[1,128], index: 5, kind: input, shape index: {}]   ;;  %s1396_s6 = inlined_call_operand.vmem [shape: bf16[128,128], index: 6, kind: input, shape index: {}]   ;;  %s1397_s7 = inlined_call_operand.vmem [shape: f32[1,128], index: 7, kind: input, shape index: {}]   ;;  %s1398_s8 = inlined_call_operand.vmem [shape: f32[1,8,128], index: 8, kind: output, shape index: {0}]   ;;  %s1399_s9 = inlined_call_operand.vmem [shape: f32[1,8,1], index: 9, kind: output, shape index: {1}]   ;;  %s1400_s10 = inlined_call_operand.hbm [shape: f32[1,8,128], index: 10, kind: output, shape index: {2}]  }
   0x1   :  { %v973_v0 = vld [vmem:[%s1392_s2 + $0x4] ss:$12 sps:$4 sm:$0xff]   ;;  %v975_v1 = vld [vmem:[%s1392_s2] ss:$12 sps:$4 sm:$0xff]   ;;  %901 = vmatprep.subr.bf16.mxu1 %v1085_v2  ;;  %293 = vmatprep.mubr.bf16.mxu0 %v1086_v3  ;;  %v976_v4 = vld [vmem:[%s1392_s2 + $0x1c] ss:$12 sps:$4 sm:$0xff]  }
   0x2   :  { %261 = vmatprep.subr.bf16.mxu0 %v973_v0  ;;  %917 = vmatprep.mubr.msk.bf16.mxu1 %vm1087_vm0, %v1085_v2  ;;  %v978_v5 = vld [vmem:[%s1392_s2 + $0x18] ss:$12 sps:$4 sm:$0xff]   ;;  %v979_v6 = vld [vmem:[%s1392_s2 + $0x34] ss:$12 sps:$4 sm:$0xff]   ;;  %v981_v7 = vld [vmem:[%s1392_s2 + $0x30] ss:$12 sps:$4 sm:$0xff]  }
   0x3   :  { %262 = vmatpush1.bf16.msra.mxu0 %v975_v1  ;;  %972 = vset.pattern.permute.xlu0 %v1086_v3  ;;  %v982_v8 = vld [vmem:[%s1392_s2 + $0x4c] ss:$12 sps:$4 sm:$0xff]   ;;  %v993_v9 = vld [vmem:[%s1392_s2 + $0x8] ss:$12 sps:$4 sm:$0xff]   ;;  %v985_v11 = vld [vmem:[%s1392_s2 + $0x64] ss:$12 sps:$4 sm:$0xff]  }
   0x4   :  { %263 = vmatprep.subr.bf16.mxu0 %v976_v4  ;;  %v984_v10 = vld [vmem:[%s1392_s2 + $0x48] ss:$12 sps:$4 sm:$0xff]   ;;  %902 = vmatpush3.bf16.msra.mxu1 %v993_v9  ;;  %v997_v12 = vld [vmem:[%s1392_s2 + $0x20] ss:$12 sps:$4 sm:$0xff]   ;;  %v999_v14 = vld [vmem:[%s1392_s2 + $0x38] ss:$12 sps:$4 sm:$0xff]  }
   0x5   :  { %903 = vmatprep.subr.bf16.mxu1 %v1085_v2  ;;  %v987_v13 = vld [vmem:[%s1392_s2 + $0x60] ss:$12 sps:$4 sm:$0xff]   ;;  %v988_v15 = vld [vmem:[%s1392_s2 + $0x7c] ss:$12 sps:$4 sm:$0xff]   ;;  %v990_v16 = vld [vmem:[%s1392_s2 + $0x78] ss:$12 sps:$4 sm:$0xff]  }
   0x6   :  { %v1003_v17 = vld [vmem:[%s1392_s2 + $0x50] ss:$12 sps:$4 sm:$0xff]   ;;  %v991_v18 = vld [vmem:[%s1392_s2 + $0x94] ss:$12 sps:$4 sm:$0xff]   ;;  %v995_v22 = vld [vmem:[%s1392_s2 + $0xac] ss:$12 sps:$4 sm:$0xff]  }
   0x7   :  { %264 = vmatpush1.bf16.msra.mxu0 %v978_v5  ;;  %v994_v19 = vld [vmem:[%s1392_s2 + $0x90] ss:$12 sps:$4 sm:$0xff]   ;;  %v80_v20 = vld [vmem:[%s1390_s0] sm:$0xff]  ;;  %v1007_v21 = vld [vmem:[%s1392_s2 + $0x68] ss:$12 sps:$4 sm:$0xff]  }
   0x8   :  { %265 = vmatprep.subr.bf16.mxu0 %v979_v6  ;;  %904 = vmatpush3.bf16.msra.mxu1 %v997_v12  ;;  %v998_v23 = vld [vmem:[%s1392_s2 + $0xa8] ss:$12 sps:$4 sm:$0xff]   ;;  %v81_v24 = vmax.f32 %v80_v20, 0.0  ;;  %v1011_v25 = vld [vmem:[%s1392_s2 + $0x80] ss:$12 sps:$4 sm:$0xff]  }
   0x9   :  { %905 = vmatprep.subr.bf16.mxu1 %v1085_v2  ;;  %v1002_v26 = vld [vmem:[%s1393_s3 + $0x4] ss:$12 sps:$4 sm:$0xff]   ;;  %v1000_v28 = vld [vmem:[%s1393_s3] ss:$12 sps:$4 sm:$0xff]   ;;  %v1006_v30 = vld [vmem:[%s1393_s3 + $0x1c] ss:$12 sps:$4 sm:$0xff]  }
   0xa   :  { %v82_v27 = vpack.c.bf16 %v81_v24, %v81_v24  ;;  %v1015_v29 = vld [vmem:[%s1392_s2 + $0x98] ss:$12 sps:$4 sm:$0xff]   ;;  %v1019_v32 = vld [vmem:[%s1392_s2 + $0xb0] ss:$12 sps:$4 sm:$0xff]   ;;  %v1010_v33 = vld [vmem:[%s1393_s3 + $0x34] ss:$12 sps:$4 sm:$0xff]  }
   0xb   :  { %266 = vmatpush1.bf16.msra.mxu0 %v981_v7  ;;  %v1004_v31 = vld [vmem:[%s1393_s3 + $0x18] ss:$12 sps:$4 sm:$0xff]   ;;  %v1008_v34 = vld [vmem:[%s1393_s3 + $0x30] ss:$12 sps:$4 sm:$0xff]   ;;  %v1026_v36 = vld [vmem:[%s1393_s3 + $0x8] ss:$12 sps:$4 sm:$0xff]  }
   0xc   :  { %267 = vmatprep.subr.bf16.mxu0 %v982_v8  ;;  %906 = vmatpush3.bf16.msra.mxu1 %v999_v14  ;;  %v1014_v35 = vld [vmem:[%s1393_s3 + $0x4c] ss:$12 sps:$4 sm:$0xff]   ;;  %v1012_v37 = vld [vmem:[%s1393_s3 + $0x48] ss:$12 sps:$4 sm:$0xff]  }
   0xd   :  { %907 = vmatprep.subr.bf16.mxu1 %v1085_v2  ;;  %v1030_v38 = vld [vmem:[%s1393_s3 + $0x20] ss:$12 sps:$4 sm:$0xff]  }
   0xf   :  { %268 = vmatpush1.bf16.msra.mxu0 %v984_v10 }
  0x10   :  { %269 = vmatprep.subr.bf16.mxu0 %v985_v11  ;;  %908 = vmatpush3.bf16.msra.mxu1 %v1003_v17 }
  0x11   :  { %909 = vmatprep.subr.bf16.mxu1 %v1085_v2 }
  0x13   :  { %270 = vmatpush1.bf16.msra.mxu0 %v987_v13 }
  0x14   :  { %271 = vmatprep.subr.bf16.mxu0 %v988_v15  ;;  %910 = vmatpush3.bf16.msra.mxu1 %v1007_v21 }
  0x15   :  { %911 = vmatprep.subr.bf16.mxu1 %v1085_v2 }
  0x17   :  { %272 = vmatpush1.bf16.msra.mxu0 %v990_v16 }
  0x18   :  { %273 = vmatprep.subr.bf16.mxu0 %v991_v18  ;;  %912 = vmatpush3.bf16.msra.mxu1 %v1011_v25 }
  0x19   :  { %913 = vmatprep.subr.bf16.mxu1 %v1085_v2 }
  0x1b   :  { %274 = vmatpush1.bf16.msra.mxu0 %v994_v19 }
  0x1c   :  { %275 = vmatprep.subr.bf16.mxu0 %v995_v22  ;;  %914 = vmatpush3.bf16.msra.mxu1 %v1015_v29 }
  0x1d   :  { %915 = vmatprep.subr.bf16.mxu1 %v1085_v2 }
  0x1f   :  { %276 = vmatpush1.bf16.msra.mxu0 %v998_v23 }
  0x20   :  { %503 = vmatprep.subr.bf16.mxu0 %v1002_v26  ;;  %916 = vmatpush3.bf16.msra.mxu1 %v1019_v32 }
  0x21   :  { %921 = vmatprep.subr.bf16.mxu1 %v1085_v2 }
  0x22   :  { %294 = vmatmul.mubr.bf16.vlgmr.msra.gmra.mrb[0].mxu0 %v82_v27 }
  0x23   :  { %504 = vmatpush1.bf16.msra.mxu0 %v1000_v28  ;;  %535 = vmatprep.mubr.bf16.mxu0 %v1086_v3 }
  0x24   :  { %505 = vmatprep.subr.bf16.mxu0 %v1006_v30  ;;  %918 = vmatmul.mubr.bf16.vlgmr.msra.gmra.mrb[0].mxu1 %v82_v27 }
  0x25   :  { %922 = vmatpush3.bf16.msra.mxu1 %v1026_v36 }
  0x27   :  { %506 = vmatpush1.bf16.msra.mxu0 %v1004_v31 }
  0x28   :  { %507 = vmatprep.subr.bf16.mxu0 %v1010_v33 }
  0x2b   :  { %508 = vmatpush1.bf16.msra.mxu0 %v1008_v34 }
  0x2c   :  { %16 = vsyncpa [#allocation6], 0  ;;  %509 = vmatprep.subr.bf16.mxu0 %v1014_v35  ;;  %v1018_v39 = vld [vmem:[%s1393_s3 + $0x64] ss:$12 sps:$4 sm:$0xff]   ;;  %923 = vmatprep.subr.bf16.mxu1 %v1085_v2  ;;  %v1016_v40 = vld [vmem:[%s1393_s3 + $0x60] ss:$12 sps:$4 sm:$0xff]   ;;  %v118_v4 = vlaneseq }
  0x2d   :  { %937 = vmatprep.mubr.msk.bf16.mxu1 %vm1087_vm0, %v1085_v2  ;;  %924 = vmatpush3.bf16.msra.mxu1 %v1030_v38  ;;  %v1031_v41 = vld [vmem:[%s1393_s3 + $0x38] ss:$12 sps:$4 sm:$0xff]   ;;  %v1022_v42 = vld [vmem:[%s1393_s3 + $0x7c] ss:$12 sps:$4 sm:$0xff]   ;;  %v1025_v45 = vld [vmem:[%s1393_s3 + $0x94] ss:$12 sps:$4 sm:$0xff]  }
  0x2e   :  { %925 = vmatprep.subr.bf16.mxu1 %v1085_v2  ;;  %v1020_v43 = vld [vmem:[%s1393_s3 + $0x78] ss:$12 sps:$4 sm:$0xff]   ;;  %v1032_v44 = vld [vmem:[%s1393_s3 + $0x50] ss:$12 sps:$4 sm:$0xff]   ;;  %v1033_v47 = vld [vmem:[%s1393_s3 + $0x68] ss:$12 sps:$4 sm:$0xff]  }
  0x2f   :  { %510 = vmatpush1.bf16.msra.mxu0 %v1012_v37  ;;  %v1023_v46 = vld [vmem:[%s1393_s3 + $0x90] ss:$12 sps:$4 sm:$0xff]   ;;  %v1029_v48 = vld [vmem:[%s1393_s3 + $0xac] ss:$12 sps:$4 sm:$0xff]   ;;  %v1027_v49 = vld [vmem:[%s1393_s3 + $0xa8] ss:$12 sps:$4 sm:$0xff]  }
  0x30   :  { %511 = vmatprep.subr.bf16.mxu0 %v1018_v39  ;;  %v1306_v50 = vld [vmem:[%s1391_s1] sm:$0xff]  ;;  %v1036_v54 = vld [vmem:[%s1393_s3 + $0xb0] ss:$12 sps:$4 sm:$0xff]   ;;  %v1038_v56 = vld [vmem:[%s1396_s6 + $0x8] sm:$0xff]   ;;  %v119_v5 = vshrl.u32 %v118_v4, 7  ;;  %vm616_vm1 = vcmask 7168  }
  0x31   :  { %926 = vmatpush3.bf16.msra.mxu1 %v1031_v41  ;;  %v1034_v51 = vld [vmem:[%s1393_s3 + $0x80] ss:$12 sps:$4 sm:$0xff]   ;;  %v342_v52 = vpack.c.bf16 %v1306_v50, %v1306_v50  ;;  %v1035_v53 = vld [vmem:[%s1393_s3 + $0x98] ss:$12 sps:$4 sm:$0xff]   ;;  %v1039_v57 = vld [vmem:[%s1396_s6 + $0x10] sm:$0xff]   ;;  %618 = vst.msk [vmem:[#allocation4] sm:$0xff] %vm616_vm1, %v1085_v2 }
  0x32   :  { %927 = vmatprep.subr.bf16.mxu1 %v1085_v2  ;;  %v1037_v55 = vld [vmem:[%s1396_s6] sm:$0xff]   ;;  %v1040_v58 = vld [vmem:[%s1396_s6 + $0x18] sm:$0xff]   ;;  %v1042_v60 = vld [vmem:[%s1396_s6 + $0x28] sm:$0xff]   ;;  %v120_v6 = vsub.s32 0, %v119_v5  ;;  %v124_v8 = vsub.s32 1, %v119_v5  ;;  %v128_v25 = vsub.s32 2, %v119_v5 }
  0x33   :  { %512 = vmatpush1.bf16.msra.mxu0 %v1016_v40  ;;  %v1041_v59 = vld [vmem:[%s1396_s6 + $0x20] sm:$0xff]   ;;  %v1043_v61 = vld [vmem:[%s1396_s6 + $0x30] sm:$0xff]   ;;  %v1044_v62 = vld [vmem:[%s1396_s6 + $0x38] sm:$0xff]  }
  0x34   :  { %513 = vmatprep.subr.bf16.mxu0 %v1022_v42  ;;  %v116_v7 = vld [vmem:[%s1394_s4] sm:$0x7] }
  0x35   :  { %928 = vmatpush3.bf16.msra.mxu1 %v1032_v44  ;;  %v121_v9 = vrot.slane %v116_v7, %v120_v6  ;;  %v125_v11 = vrot.slane %v116_v7, %v124_v8  ;;  %v864_v27 = vld [vmem:[%s1395_s5] ss:$0 sm:$0xff]  ;;  %v129_v28 = vrot.slane %v116_v7, %v128_v25 }
  0x36   :  { %929 = vmatprep.subr.bf16.mxu1 %v1085_v2  ;;  %v865_v44 = vld [vmem:[%s1397_s7] ss:$0 sm:$0xff]  ;;  %s1089_s7 = smov [#allocation5]  }
  0x37   :  { %514 = vmatpush1.bf16.msra.mxu0 %v1020_v43  ;;  %v1088_v43 = vmov -inf   ;;  %s780_s25 = sshll.u32 %s1089_s7, 4  ;;  %s781_s25 = int_to_ptr.vmem [resolvable:$true] %s780_s25 }
  0x38   :  { %515 = vmatprep.subr.bf16.mxu0 %v1025_v45  ;;  %617 = vst.msk [vmem:[#allocation3] sm:$0xff] %vm616_vm1, %v1088_v43  ;;  %s1061_s1 = scalar_lea.vmem %s781_s25, 128  ;;  %p1066_p1 = scmp.lt.s32.totalorder %s781_s25, %s781_s25 }
  0x39   :  { %930 = vmatpush3.bf16.msra.mxu1 %v1033_v47  ;;  %p1062_p0 = scmp.ne.s32.totalorder %s781_s25, %s1061_s1  ;;  %p1067_p2 = scmp.lt.s32.totalorder %s1061_s1, %s1061_s1 }
  0x3a   :  { %931 = vmatprep.subr.bf16.mxu1 %v1085_v2 }
  0x3b   :  { %516 = vmatpush1.bf16.msra.mxu0 %v1023_v46  ;;  %p1068_p3 = por %p1067_p2, %p1066_p1 }
  0x3c   :  { %517 = vmatprep.subr.bf16.mxu0 %v1029_v48 }
  0x3d   :  { %932 = vmatpush3.bf16.msra.mxu1 %v1034_v51  ;;  %p1069_p4 = pnand %p1068_p3, %p1062_p0 }
  0x3e   :  { %933 = vmatprep.subr.bf16.mxu1 %v1085_v2 }
  0x3f   :  { %518 = vmatpush1.bf16.msra.mxu0 %v1027_v49 }
  0x40   :  { %941 = vmatprep.subr.bf16.mxu0 %v1085_v2 }
  0x41   :  { %934 = vmatpush3.bf16.msra.mxu1 %v1035_v53 }
  0x42   :  { %536 = vmatmul.mubr.bf16.vlgmr.msra.gmra.mrb[0].mxu0 %v342_v52  ;;  %935 = vmatprep.subr.bf16.mxu1 %v1085_v2 }
  0x43   :  { %957 = vmatprep.mubr.msk.bf16.mxu0 %vm1087_vm0, %v1085_v2  ;;  %942 = vmatpush3.bf16.msra.mxu0 %v1037_v55 }
  0x44   :  { %943 = vmatprep.subr.bf16.mxu0 %v1085_v2 }
  0x45   :  { %936 = vmatpush3.bf16.msra.mxu1 %v1036_v54 }
  0x47   :  { %944 = vmatpush3.bf16.msra.mxu0 %v1038_v56 }
  0x48   :  { %938 = vmatmul.mubr.bf16.vlgmr.msra.gmra.mrb[4].mxu1 %v342_v52  ;;  %945 = vmatprep.subr.bf16.mxu0 %v1085_v2 }
  0x4b   :  { %946 = vmatpush3.bf16.msra.mxu0 %v1039_v57 }
  0x4c   :  { %947 = vmatprep.subr.bf16.mxu0 %v1085_v2 }
  0x4f   :  { %948 = vmatpush3.bf16.msra.mxu0 %v1040_v58 }
  0x50   :  { %949 = vmatprep.subr.bf16.mxu0 %v1085_v2 }
  0x53   :  { %950 = vmatpush3.bf16.msra.mxu0 %v1041_v59 }
  0x54   :  { %951 = vmatprep.subr.bf16.mxu0 %v1085_v2 }
  0x57   :  { %952 = vmatpush3.bf16.msra.mxu0 %v1042_v60 }
  0x58   :  { %953 = vmatprep.subr.bf16.mxu0 %v1085_v2 }
  0x5b   :  { %954 = vmatpush3.bf16.msra.mxu0 %v1043_v61 }
  0x5c   :  { %955 = vmatprep.subr.bf16.mxu0 %v1085_v2 }
  0x5f   :  { %956 = vmatpush3.bf16.msra.mxu0 %v1044_v62 }
  0xf7   :  { %v336_v63 = vpop.f32.mrb[0].mxu1 }
  0xf8   :  { %v919_v0 = vpop.f32.mrb[1].mxu1  ;;  %v337_v32 = vadd.f32 %v336_v63, %v129_v28 }
  0xf9   :  { %v339_v1 = vpop.f32.mrb[2].mxu1 }
  0xfa   :  { %v920_v3 = vpop.f32.mrb[3].mxu1 }
 0x115   :  { %v537_v10 = vpop.f32.mrb[0].mxu0 }
 0x116   :  { %v961_v12 = vadd.f32 %v537_v10, %v121_v9  ;;  %v539_v13 = vpop.f32.mrb[1].mxu0 }
 0x117   :  { %v541_v14 = vpop.f32.mrb[2].mxu0  ;;  %v962_v17 = vadd.f32 %v539_v13, %v125_v11 }
 0x118   :  { %v862_v15 = vmul.f32 -1.442695, %v961_v12  ;;  %v542_v16 = vpop.f32.mrb[3].mxu0 }
 0x119   :  { %v863_v18 = vmul.f32 -1.442695, %v962_v17 }
 0x11a   :  { %1045 = vpow2.f32 %v862_v15 }
 0x11b   :  { %v578_v19 = vpop.f32.mrb[4].mxu1  ;;  %1047 = vpow2.f32 %v863_v18 }
 0x11c   :  { %v939_v20 = vpop.f32.mrb[5].mxu1  ;;  %v605_v30 = vadd.f32 %v864_v27, %v578_v19 }
 0x11d   :  { %v581_v21 = vpop.f32.mrb[6].mxu1 }
 0x11e   :  { %v940_v22 = vpop.f32.mrb[7].mxu1 }
 0x124   :  { %v1046_v23 = vpop.eup %1045 }
 0x125   :  { %v588_v24 = vadd.f32 1.0, %v1046_v23  ;;  %v1048_v26 = vpop.eup %1047 }
 0x126   :  { %v595_v29 = vadd.f32 1.0, %v1048_v26 }
 0x127   :  { %1049 = vrcp.f32 %v588_v24 }
 0x128   :  { %1051 = vrcp.f32 %v595_v29 }
 0x131   :  { %v1050_v31 = vpop.eup %1049 }
 0x132   :  { %v606_v33 = vmul.f32 %v1050_v31, %v605_v30  ;;  %v1052_v35 = vpop.eup %1051 }
 0x133   :  { %v609_v36 = vsub.f32 1.0, %v1052_v35  ;;  %v611_v38 = vmul.f32 %v1052_v35, %v1306_v50  ;;  %v732_v50 = vld [vmem:[#allocation3] sm:$0xff] }
 0x134   :  { %v607_v34 = vadd.f32 %v606_v33, %v337_v32 }
 0x136   :  { %1053 = vtanh.f32 %v607_v34 }
 0x140   :  { %v1054_v37 = vpop.eup %1053 }
 0x141   :  { %v610_v39 = vmul.f32 %v1054_v37, %v609_v36 }
 0x143   :  { %v612_v40 = vadd.f32 %v611_v38, %v610_v39 }
 0x145   :  { %v614_v41 = vpack.c.bf16 %v612_v40, %v612_v40  ;;  %613 = vst [vmem:[#allocation5] sm:$0xff] %v612_v40 }
 0x147   :  { %615 = vst [vmem:[#allocation2] sm:$0xf] %v614_v41 }
 0x14e   :  { %v619_v42 = vld [vmem:[#allocation2] sm:$0xf] }
 0x14f   :  { %958 = vmatmul.mubr.bf16.vlgmr.msra.gmra.mrb[4].mxu0 %v619_v42 }
 0x222   :  { %v725_v45 = vpop.f32.mrb[4].mxu0 }
 0x223   :  { %v726_v46 = vadd.f32 %v865_v44, %v725_v45  ;;  %v959_v47 = vpop.f32.mrb[5].mxu0 }
 0x224   :  { %v728_v48 = vpop.f32.mrb[6].mxu0 }
 0x225   :  { %731 = vst [vmem:[%s1398_s8] sm:$0xff] %v726_v46  ;;  %733 = vmax.xlane.f32.xlu0 %v726_v46  ;;  %v960_v49 = vpop.f32.mrb[7].mxu0 }
 0x2b2   :  { %v734_v51 = vpop.xlane.xlu0 %733 }
 0x2b3   :  { %v735_v52 = vmax.f32 %v732_v50, %v734_v51 }
 0x2b5   :  { %v737_v53 = vsub.f32 %v732_v50, %v735_v52  ;;  %754 = vst.msk [vmem:[#allocation3] sm:$0xff] %vm616_vm1, %v735_v52  ;;  %743 = vperm.xlu0 %972, %v735_v52  }
 0x334   :  { %v744_v2 = vpop.permute.xlu0 %743 }
 0x335   :  { %v746_v54 = vsub.f32 %v726_v46, %v744_v2 }
 0x337   :  { %v747_v55 = vmul.f32 1.442695, %v746_v54 }
 0x339   :  { %1055 = vpow2.f32 %v747_v55 }
 0x343   :  { %v1056_v56 = vpop.eup %1055 }
 0x344   :  { %749 = vadd.xlane.f32.xlu1 %v1056_v56 }
 0x345   :  { %1072 = shalt.err (!%p1069_p4)
}
 0x346   :  { %s1073_s27 = scalar_lea.hbm %s1400_s10, 128 }
 0x347   :  { %p1074_p5 = scmp.ne.s32.totalorder %s1400_s10, %s1073_s27  ;;  %p1077_p6 = scmp.lt.u32.totalorder %s1073_s27, %s1400_s10 }
 0x349   :  { %p1079_p7 = pnand %p1077_p6, %p1074_p5 }
 0x34b   :  { %1082 = shalt.err (!%p1079_p7)
}
 0x34c   :  { %783 = dma.vmem_to_hbm [thread:$0]  %s781_s25, 128, %s1400_s10, [#allocation6]   ;;  %v738_v57 = vmul.f32 1.442695, %v737_v53  ;;  %v736_v59 = vld [vmem:[#allocation4] sm:$0xff]  ;;  %v758_v3 = vld [vmem:[#allocation3] sm:$0xff] }
 0x34e   :  { %1057 = vpow2.f32 %v738_v57 }
 0x358   :  { %v1058_v58 = vpop.eup %1057 }
 0x359   :  { %v740_v60 = vmul.f32 %v1058_v58, %v736_v59 }
 0x3d1   :  { %v750_v61 = vpop.xlane.xlu1 %749 }
 0x3d2   :  { %v751_v62 = vadd.f32 %v750_v61, %v740_v60 }
 0x3d4   :  { %753 = vst.msk [vmem:[#allocation4] sm:$0xff] %vm616_vm1, %v751_v62 }
 0x3db   :  { %v759_v63 = vld [vmem:[#allocation4] sm:$0xff] }
 0x3dc   :  { %1059 = vlog2.f32 %v759_v63 }
 0x3e6   :  { %v1060_v0 = vpop.eup %1059 }
 0x3e7   :  { %v761_v1 = vmul.f32 0.6931472, %v1060_v0 }
 0x3e9   :  { %v762_v4 = vadd.f32 %v761_v1, %v758_v3 }
 0x3eb   :  { %763 = vst.msk [vmem:[%s1399_s9] sm:$0xff] %vm616_vm1, %v762_v4 }
 0x3ec   :  { %1083 = dma.done.wait [#allocation6], 128  }
 0x3ed   :  { %1084 = vsyncadd [#allocation6], 4294967168 }
 0x3ee   :  { %796 = vsyncpa [#allocation6], 1 }

// kernel: decoder_rnn_forward.1
= control target key start
LH: loop header
LB: loop body
LE: loop exit
PB: predicated region body
PF: predicated region fallthrough
CT: control target
= control target key end

     0   :  { %v1085_v2 = vmov 0.0   ;;  %v1086_v3 = vmov 0   ;;  %vm1087_vm0 = vmmov 0   ;;  %s1390_s0 = inlined_call_operand.vmem [shape: f32[8,128], index: 0, kind: input, shape index: {}]   ;;  %s1391_s1 = inlined_call_operand.vmem [shape: f32[8,128], index: 1, kind: input, shape index: {}]   ;;  %s1392_s2 = inlined_call_operand.vmem [shape: bf16[128,384], index: 2, kind: input, shape index: {}]   ;;  %s1393_s3 = inlined_call_operand.vmem [shape: bf16[128,384], index: 3, kind: input, shape index: {}]   ;;  %s1394_s4 = inlined_call_operand.vmem [shape: f32[1,384], index: 4, kind: input, shape index: {}]   ;;  %s1395_s5 = inlined_call_operand.vmem [shape: f32[1,128], index: 5, kind: input, shape index: {}]   ;;  %s1396_s6 = inlined_call_operand.vmem [shape: bf16[128,128], index: 6, kind: input, shape index: {}]   ;;  %s1397_s7 = inlined_call_operand.vmem [shape: f32[1,128], index: 7, kind: input, shape index: {}]   ;;  %s1398_s8 = inlined_call_operand.vmem [shape: f32[1,8,128], index: 8, kind: output, shape index: {0}]   ;;  %s1399_s9 = inlined_call_operand.vmem [shape: f32[1,8,1], index: 9, kind: output, shape index: {1}]   ;;  %s1400_s10 = inlined_call_operand.hbm [shape: f32[1,8,128], index: 10, kind: output, shape index: {2}]  }
   0x1   :  { %v973_v0 = vld [vmem:[%s1392_s2 + $0x4] ss:$12 sps:$4 sm:$0xff]   ;;  %v975_v1 = vld [vmem:[%s1392_s2] ss:$12 sps:$4 sm:$0xff]   ;;  %901 = vmatprep.subr.bf16.mxu1 %v1085_v2  ;;  %293 = vmatprep.mubr.bf16.mxu0 %v1086_v3  ;;  %v976_v4 = vld [vmem:[%s1392_s2 + $0x1c] ss:$12 sps:$4 sm:$0xff]  }
   0x2   :  { %261 = vmatprep.subr.bf16.mxu0 %v973_v0  ;;  %917 = vmatprep.mubr.msk.bf16.mxu1 %vm1087_vm0, %v1085_v2  ;;  %v978_v5 = vld [vmem:[%s1392_s2 + $0x18] ss:$12 sps:$4 sm:$0xff]   ;;  %v979_v6 = vld [vmem:[%s1392_s2 + $0x34] ss:$12 sps:$4 sm:$0xff]   ;;  %v981_v7 = vld [vmem:[%s1392_s2 + $0x30] ss:$12 sps:$4 sm:$0xff]  }
   0x3   :  { %262 = vmatpush1.bf16.msra.mxu0 %v975_v1  ;;  %972 = vset.pattern.permute.xlu0 %v1086_v3  ;;  %v982_v8 = vld [vmem:[%s1392_s2 + $0x4c] ss:$12 sps:$4 sm:$0xff]   ;;  %v993_v9 = vld [vmem:[%s1392_s2 + $0x8] ss:$12 sps:$4 sm:$0xff]   ;;  %v985_v11 = vld [vmem:[%s1392_s2 + $0x64] ss:$12 sps:$4 sm:$0xff]  }
   0x4   :  { %263 = vmatprep.subr.bf16.mxu0 %v976_v4  ;;  %v984_v10 = vld [vmem:[%s1392_s2 + $0x48] ss:$12 sps:$4 sm:$0xff]   ;;  %902 = vmatpush3.bf16.msra.mxu1 %v993_v9  ;;  %v997_v12 = vld [vmem:[%s1392_s2 + $0x20] ss:$12 sps:$4 sm:$0xff]   ;;  %v999_v14 = vld [vmem:[%s1392_s2 + $0x38] ss:$12 sps:$4 sm:$0xff]  }
   0x5   :  { %903 = vmatprep.subr.bf16.mxu1 %v1085_v2  ;;  %v987_v13 = vld [vmem:[%s1392_s2 + $0x60] ss:$12 sps:$4 sm:$0xff]   ;;  %v988_v15 = vld [vmem:[%s1392_s2 + $0x7c] ss:$12 sps:$4 sm:$0xff]   ;;  %v990_v16 = vld [vmem:[%s1392_s2 + $0x78] ss:$12 sps:$4 sm:$0xff]  }
   0x6   :  { %v1003_v17 = vld [vmem:[%s1392_s2 + $0x50] ss:$12 sps:$4 sm:$0xff]   ;;  %v991_v18 = vld [vmem:[%s1392_s2 + $0x94] ss:$12 sps:$4 sm:$0xff]   ;;  %v995_v22 = vld [vmem:[%s1392_s2 + $0xac] ss:$12 sps:$4 sm:$0xff]  }
   0x7   :  { %264 = vmatpush1.bf16.msra.mxu0 %v978_v5  ;;  %v994_v19 = vld [vmem:[%s1392_s2 + $0x90] ss:$12 sps:$4 sm:$0xff]   ;;  %v80_v20 = vld [vmem:[%s1390_s0] sm:$0xff]  ;;  %v1007_v21 = vld [vmem:[%s1392_s2 + $0x68] ss:$12 sps:$4 sm:$0xff]  }
   0x8   :  { %265 = vmatprep.subr.bf16.mxu0 %v979_v6  ;;  %904 = vmatpush3.bf16.msra.mxu1 %v997_v12  ;;  %v998_v23 = vld [vmem:[%s1392_s2 + $0xa8] ss:$12 sps:$4 sm:$0xff]   ;;  %v81_v24 = vmax.f32 %v80_v20, 0.0  ;;  %v1011_v25 = vld [vmem:[%s1392_s2 + $0x80] ss:$12 sps:$4 sm:$0xff]  }
   0x9   :  { %905 = vmatprep.subr.bf16.mxu1 %v1085_v2  ;;  %v1002_v26 = vld [vmem:[%s1393_s3 + $0x4] ss:$12 sps:$4 sm:$0xff]   ;;  %v1000_v28 = vld [vmem:[%s1393_s3] ss:$12 sps:$4 sm:$0xff]   ;;  %v1006_v30 = vld [vmem:[%s1393_s3 + $0x1c] ss:$12 sps:$4 sm:$0xff]  }
   0xa   :  { %v82_v27 = vpack.c.bf16 %v81_v24, %v81_v24  ;;  %v1015_v29 = vld [vmem:[%s1392_s2 + $0x98] ss:$12 sps:$4 sm:$0xff]   ;;  %v1019_v32 = vld [vmem:[%s1392_s2 + $0xb0] ss:$12 sps:$4 sm:$0xff]   ;;  %v1010_v33 = vld [vmem:[%s1393_s3 + $0x34] ss:$12 sps:$4 sm:$0xff]  }
   0xb   :  { %266 = vmatpush1.bf16.msra.mxu0 %v981_v7  ;;  %v1004_v31 = vld [vmem:[%s1393_s3 + $0x18] ss:$12 sps:$4 sm:$0xff]   ;;  %v1008_v34 = vld [vmem:[%s1393_s3 + $0x30] ss:$12 sps:$4 sm:$0xff]   ;;  %v1026_v36 = vld [vmem:[%s1393_s3 + $0x8] ss:$12 sps:$4 sm:$0xff]  }
   0xc   :  { %267 = vmatprep.subr.bf16.mxu0 %v982_v8  ;;  %906 = vmatpush3.bf16.msra.mxu1 %v999_v14  ;;  %v1014_v35 = vld [vmem:[%s1393_s3 + $0x4c] ss:$12 sps:$4 sm:$0xff]   ;;  %v1012_v37 = vld [vmem:[%s1393_s3 + $0x48] ss:$12 sps:$4 sm:$0xff]  }
   0xd   :  { %907 = vmatprep.subr.bf16.mxu1 %v1085_v2  ;;  %v1030_v38 = vld [vmem:[%s1393_s3 + $0x20] ss:$12 sps:$4 sm:$0xff]  }
   0xf   :  { %268 = vmatpush1.bf16.msra.mxu0 %v984_v10 }
  0x10   :  { %269 = vmatprep.subr.bf16.mxu0 %v985_v11  ;;  %908 = vmatpush3.bf16.msra.mxu1 %v1003_v17 }
  0x11   :  { %909 = vmatprep.subr.bf16.mxu1 %v1085_v2 }
  0x13   :  { %270 = vmatpush1.bf16.msra.mxu0 %v987_v13 }
  0x14   :  { %271 = vmatprep.subr.bf16.mxu0 %v988_v15  ;;  %910 = vmatpush3.bf16.msra.mxu1 %v1007_v21 }
  0x15   :  { %911 = vmatprep.subr.bf16.mxu1 %v1085_v2 }
  0x17   :  { %272 = vmatpush1.bf16.msra.mxu0 %v990_v16 }
  0x18   :  { %273 = vmatprep.subr.bf16.mxu0 %v991_v18  ;;  %912 = vmatpush3.bf16.msra.mxu1 %v1011_v25 }
  0x19   :  { %913 = vmatprep.subr.bf16.mxu1 %v1085_v2 }
  0x1b   :  { %274 = vmatpush1.bf16.msra.mxu0 %v994_v19 }
  0x1c   :  { %275 = vmatprep.subr.bf16.mxu0 %v995_v22  ;;  %914 = vmatpush3.bf16.msra.mxu1 %v1015_v29 }
  0x1d   :  { %915 = vmatprep.subr.bf16.mxu1 %v1085_v2 }
  0x1f   :  { %276 = vmatpush1.bf16.msra.mxu0 %v998_v23 }
  0x20   :  { %503 = vmatprep.subr.bf16.mxu0 %v1002_v26  ;;  %916 = vmatpush3.bf16.msra.mxu1 %v1019_v32 }
  0x21   :  { %921 = vmatprep.subr.bf16.mxu1 %v1085_v2 }
  0x22   :  { %294 = vmatmul.mubr.bf16.vlgmr.msra.gmra.mrb[0].mxu0 %v82_v27 }
  0x23   :  { %504 = vmatpush1.bf16.msra.mxu0 %v1000_v28  ;;  %535 = vmatprep.mubr.bf16.mxu0 %v1086_v3 }
  0x24   :  { %505 = vmatprep.subr.bf16.mxu0 %v1006_v30  ;;  %918 = vmatmul.mubr.bf16.vlgmr.msra.gmra.mrb[0].mxu1 %v82_v27 }
  0x25   :  { %922 = vmatpush3.bf16.msra.mxu1 %v1026_v36 }
  0x27   :  { %506 = vmatpush1.bf16.msra.mxu0 %v1004_v31 }
  0x28   :  { %507 = vmatprep.subr.bf16.mxu0 %v1010_v33 }
  0x2b   :  { %508 = vmatpush1.bf16.msra.mxu0 %v1008_v34 }
  0x2c   :  { %16 = vsyncpa [#allocation6], 0  ;;  %509 = vmatprep.subr.bf16.mxu0 %v1014_v35  ;;  %v1018_v39 = vld [vmem:[%s1393_s3 + $0x64] ss:$12 sps:$4 sm:$0xff]   ;;  %923 = vmatprep.subr.bf16.mxu1 %v1085_v2  ;;  %v1016_v40 = vld [vmem:[%s1393_s3 + $0x60] ss:$12 sps:$4 sm:$0xff]   ;;  %v118_v4 = vlaneseq }
  0x2d   :  { %937 = vmatprep.mubr.msk.bf16.mxu1 %vm1087_vm0, %v1085_v2  ;;  %924 = vmatpush3.bf16.msra.mxu1 %v1030_v38  ;;  %v1031_v41 = vld [vmem:[%s1393_s3 + $0x38] ss:$12 sps:$4 sm:$0xff]   ;;  %v1022_v42 = vld [vmem:[%s1393_s3 + $0x7c] ss:$12 sps:$4 sm:$0xff]   ;;  %v1025_v45 = vld [vmem:[%s1393_s3 + $0x94] ss:$12 sps:$4 sm:$0xff]  }
  0x2e   :  { %925 = vmatprep.subr.bf16.mxu1 %v1085_v2  ;;  %v1020_v43 = vld [vmem:[%s1393_s3 + $0x78] ss:$12 sps:$4 sm:$0xff]   ;;  %v1032_v44 = vld [vmem:[%s1393_s3 + $0x50] ss:$12 sps:$4 sm:$0xff]   ;;  %v1033_v47 = vld [vmem:[%s1393_s3 + $0x68] ss:$12 sps:$4 sm:$0xff]  }
  0x2f   :  { %510 = vmatpush1.bf16.msra.mxu0 %v1012_v37  ;;  %v1023_v46 = vld [vmem:[%s1393_s3 + $0x90] ss:$12 sps:$4 sm:$0xff]   ;;  %v1029_v48 = vld [vmem:[%s1393_s3 + $0xac] ss:$12 sps:$4 sm:$0xff]   ;;  %v1027_v49 = vld [vmem:[%s1393_s3 + $0xa8] ss:$12 sps:$4 sm:$0xff]  }
  0x30   :  { %511 = vmatprep.subr.bf16.mxu0 %v1018_v39  ;;  %v1306_v50 = vld [vmem:[%s1391_s1] sm:$0xff]  ;;  %v1036_v54 = vld [vmem:[%s1393_s3 + $0xb0] ss:$12 sps:$4 sm:$0xff]   ;;  %v1038_v56 = vld [vmem:[%s1396_s6 + $0x8] sm:$0xff]   ;;  %v119_v5 = vshrl.u32 %v118_v4, 7  ;;  %vm616_vm1 = vcmask 7168  }
  0x31   :  { %926 = vmatpush3.bf16.msra.mxu1 %v1031_v41  ;;  %v1034_v51 = vld [vmem:[%s1393_s3 + $0x80] ss:$12 sps:$4 sm:$0xff]   ;;  %v342_v52 = vpack.c.bf16 %v1306_v50, %v1306_v50  ;;  %v1035_v53 = vld [vmem:[%s1393_s3 + $0x98] ss:$12 sps:$4 sm:$0xff]   ;;  %v1039_v57 = vld [vmem:[%s1396_s6 + $0x10] sm:$0xff]   ;;  %618 = vst.msk [vmem:[#allocation4] sm:$0xff] %vm616_vm1, %v1085_v2 }
  0x32   :  { %927 = vmatprep.subr.bf16.mxu1 %v1085_v2  ;;  %v1037_v55 = vld [vmem:[%s1396_s6] sm:$0xff]   ;;  %v1040_v58 = vld [vmem:[%s1396_s6 + $0x18] sm:$0xff]   ;;  %v1042_v60 = vld [vmem:[%s1396_s6 + $0x28] sm:$0xff]   ;;  %v120_v6 = vsub.s32 0, %v119_v5  ;;  %v124_v8 = vsub.s32 1, %v119_v5  ;;  %v128_v25 = vsub.s32 2, %v119_v5 }
  0x33   :  { %512 = vmatpush1.bf16.msra.mxu0 %v1016_v40  ;;  %v1041_v59 = vld [vmem:[%s1396_s6 + $0x20] sm:$0xff]   ;;  %v1043_v61 = vld [vmem:[%s1396_s6 + $0x30] sm:$0xff]   ;;  %v1044_v62 = vld [vmem:[%s1396_s6 + $0x38] sm:$0xff]  }
  0x34   :  { %513 = vmatprep.subr.bf16.mxu0 %v1022_v42  ;;  %v116_v7 = vld [vmem:[%s1394_s4] sm:$0x7] }
  0x35   :  { %928 = vmatpush3.bf16.msra.mxu1 %v1032_v44  ;;  %v121_v9 = vrot.slane %v116_v7, %v120_v6  ;;  %v125_v11 = vrot.slane %v116_v7, %v124_v8  ;;  %v864_v27 = vld [vmem:[%s1395_s5] ss:$0 sm:$0xff]  ;;  %v129_v28 = vrot.slane %v116_v7, %v128_v25 }
  0x36   :  { %929 = vmatprep.subr.bf16.mxu1 %v1085_v2  ;;  %v865_v44 = vld [vmem:[%s1397_s7] ss:$0 sm:$0xff]  ;;  %s1089_s7 = smov [#allocation5]  }
  0x37   :  { %514 = vmatpush1.bf16.msra.mxu0 %v1020_v43  ;;  %v1088_v43 = vmov -inf   ;;  %s780_s25 = sshll.u32 %s1089_s7, 4  ;;  %s781_s25 = int_to_ptr.vmem [resolvable:$true] %s780_s25 }
  0x38   :  { %515 = vmatprep.subr.bf16.mxu0 %v1025_v45  ;;  %617 = vst.msk [vmem:[#allocation3] sm:$0xff] %vm616_vm1, %v1088_v43  ;;  %s1061_s1 = scalar_lea.vmem %s781_s25, 128  ;;  %p1066_p1 = scmp.lt.s32.totalorder %s781_s25, %s781_s25 }
  0x39   :  { %930 = vmatpush3.bf16.msra.mxu1 %v1033_v47  ;;  %p1062_p0 = scmp.ne.s32.totalorder %s781_s25, %s1061_s1  ;;  %p1067_p2 = scmp.lt.s32.totalorder %s1061_s1, %s1061_s1 }
  0x3a   :  { %931 = vmatprep.subr.bf16.mxu1 %v1085_v2 }
  0x3b   :  { %516 = vmatpush1.bf16.msra.mxu0 %v1023_v46  ;;  %p1068_p3 = por %p1067_p2, %p1066_p1 }
  0x3c   :  { %517 = vmatprep.subr.bf16.mxu0 %v1029_v48 }
  0x3d   :  { %932 = vmatpush3.bf16.msra.mxu1 %v1034_v51  ;;  %p1069_p4 = pnand %p1068_p3, %p1062_p0 }
  0x3e   :  { %933 = vmatprep.subr.bf16.mxu1 %v1085_v2 }
  0x3f   :  { %518 = vmatpush1.bf16.msra.mxu0 %v1027_v49 }
  0x40   :  { %941 = vmatprep.subr.bf16.mxu0 %v1085_v2 }
  0x41   :  { %934 = vmatpush3.bf16.msra.mxu1 %v1035_v53 }
  0x42   :  { %536 = vmatmul.mubr.bf16.vlgmr.msra.gmra.mrb[0].mxu0 %v342_v52  ;;  %935 = vmatprep.subr.bf16.mxu1 %v1085_v2 }
  0x43   :  { %957 = vmatprep.mubr.msk.bf16.mxu0 %vm1087_vm0, %v1085_v2  ;;  %942 = vmatpush3.bf16.msra.mxu0 %v1037_v55 }
  0x44   :  { %943 = vmatprep.subr.bf16.mxu0 %v1085_v2 }
  0x45   :  { %936 = vmatpush3.bf16.msra.mxu1 %v1036_v54 }
  0x47   :  { %944 = vmatpush3.bf16.msra.mxu0 %v1038_v56 }
  0x48   :  { %938 = vmatmul.mubr.bf16.vlgmr.msra.gmra.mrb[4].mxu1 %v342_v52  ;;  %945 = vmatprep.subr.bf16.mxu0 %v1085_v2 }
  0x4b   :  { %946 = vmatpush3.bf16.msra.mxu0 %v1039_v57 }
  0x4c   :  { %947 = vmatprep.subr.bf16.mxu0 %v1085_v2 }
  0x4f   :  { %948 = vmatpush3.bf16.msra.mxu0 %v1040_v58 }
  0x50   :  { %949 = vmatprep.subr.bf16.mxu0 %v1085_v2 }
  0x53   :  { %950 = vmatpush3.bf16.msra.mxu0 %v1041_v59 }
  0x54   :  { %951 = vmatprep.subr.bf16.mxu0 %v1085_v2 }
  0x57   :  { %952 = vmatpush3.bf16.msra.mxu0 %v1042_v60 }
  0x58   :  { %953 = vmatprep.subr.bf16.mxu0 %v1085_v2 }
  0x5b   :  { %954 = vmatpush3.bf16.msra.mxu0 %v1043_v61 }
  0x5c   :  { %955 = vmatprep.subr.bf16.mxu0 %v1085_v2 }
  0x5f   :  { %956 = vmatpush3.bf16.msra.mxu0 %v1044_v62 }
  0xf7   :  { %v336_v63 = vpop.f32.mrb[0].mxu1 }
  0xf8   :  { %v919_v0 = vpop.f32.mrb[1].mxu1  ;;  %v337_v32 = vadd.f32 %v336_v63, %v129_v28 }
  0xf9   :  { %v339_v1 = vpop.f32.mrb[2].mxu1 }
  0xfa   :  { %v920_v3 = vpop.f32.mrb[3].mxu1 }
 0x115   :  { %v537_v10 = vpop.f32.mrb[0].mxu0 }
 0x116   :  { %v961_v12 = vadd.f32 %v537_v10, %v121_v9  ;;  %v539_v13 = vpop.f32.mrb[1].mxu0 }
 0x117   :  { %v541_v14 = vpop.f32.mrb[2].mxu0  ;;  %v962_v17 = vadd.f32 %v539_v13, %v125_v11 }
 0x118   :  { %v862_v15 = vmul.f32 -1.442695, %v961_v12  ;;  %v542_v16 = vpop.f32.mrb[3].mxu0 }
 0x119   :  { %v863_v18 = vmul.f32 -1.442695, %v962_v17 }
 0x11a   :  { %1045 = vpow2.f32 %v862_v15 }
 0x11b   :  { %v578_v19 = vpop.f32.mrb[4].mxu1  ;;  %1047 = vpow2.f32 %v863_v18 }
 0x11c   :  { %v939_v20 = vpop.f32.mrb[5].mxu1  ;;  %v605_v30 = vadd.f32 %v864_v27, %v578_v19 }
 0x11d   :  { %v581_v21 = vpop.f32.mrb[6].mxu1 }
 0x11e   :  { %v940_v22 = vpop.f32.mrb[7].mxu1 }
 0x124   :  { %v1046_v23 = vpop.eup %1045 }
 0x125   :  { %v588_v24 = vadd.f32 1.0, %v1046_v23  ;;  %v1048_v26 = vpop.eup %1047 }
 0x126   :  { %v595_v29 = vadd.f32 1.0, %v1048_v26 }
 0x127   :  { %1049 = vrcp.f32 %v588_v24 }
 0x128   :  { %1051 = vrcp.f32 %v595_v29 }
 0x131   :  { %v1050_v31 = vpop.eup %1049 }
 0x132   :  { %v606_v33 = vmul.f32 %v1050_v31, %v605_v30  ;;  %v1052_v35 = vpop.eup %1051 }
 0x133   :  { %v609_v36 = vsub.f32 1.0, %v1052_v35  ;;  %v611_v38 = vmul.f32 %v1052_v35, %v1306_v50  ;;  %v732_v50 = vld [vmem:[#allocation3] sm:$0xff] }
 0x134   :  { %v607_v34 = vadd.f32 %v606_v33, %v337_v32 }
 0x136   :  { %1053 = vtanh.f32 %v607_v34 }
 0x140   :  { %v1054_v37 = vpop.eup %1053 }
 0x141   :  { %v610_v39 = vmul.f32 %v1054_v37, %v609_v36 }
 0x143   :  { %v612_v40 = vadd.f32 %v611_v38, %v610_v39 }
 0x145   :  { %v614_v41 = vpack.c.bf16 %v612_v40, %v612_v40  ;;  %613 = vst [vmem:[#allocation5] sm:$0xff] %v612_v40 }
 0x147   :  { %615 = vst [vmem:[#allocation2] sm:$0xf] %v614_v41 }
 0x14e   :  { %v619_v42 = vld [vmem:[#allocation2] sm:$0xf] }
 0x14f   :  { %958 = vmatmul.mubr.bf16.vlgmr.msra.gmra.mrb[4].mxu0 %v619_v42 }
 0x222   :  { %v725_v45 = vpop.f32.mrb[4].mxu0 }
 0x223   :  { %v726_v46 = vadd.f32 %v865_v44, %v725_v45  ;;  %v959_v47 = vpop.f32.mrb[5].mxu0 }
 0x224   :  { %v728_v48 = vpop.f32.mrb[6].mxu0 }
 0x225   :  { %731 = vst [vmem:[%s1398_s8] sm:$0xff] %v726_v46  ;;  %733 = vmax.xlane.f32.xlu0 %v726_v46  ;;  %v960_v49 = vpop.f32.mrb[7].mxu0 }
 0x2b2   :  { %v734_v51 = vpop.xlane.xlu0 %733 }
 0x2b3   :  { %v735_v52 = vmax.f32 %v732_v50, %v734_v51 }
 0x2b5   :  { %v737_v53 = vsub.f32 %v732_v50, %v735_v52  ;;  %754 = vst.msk [vmem:[#allocation3] sm:$0xff] %vm616_vm1, %v735_v52  ;;  %743 = vperm.xlu0 %972, %v735_v52  }
 0x334   :  { %v744_v2 = vpop.permute.xlu0 %743 }
 0x335   :  { %v746_v54 = vsub.f32 %v726_v46, %v744_v2 }
 0x337   :  { %v747_v55 = vmul.f32 1.442695, %v746_v54 }
 0x339   :  { %1055 = vpow2.f32 %v747_v55 }
 0x343   :  { %v1056_v56 = vpop.eup %1055 }
 0x344   :  { %749 = vadd.xlane.f32.xlu1 %v1056_v56 }
 0x345   :  { %1072 = shalt.err (!%p1069_p4)
}
 0x346   :  { %s1073_s27 = scalar_lea.hbm %s1400_s10, 128 }
 0x347   :  { %p1074_p5 = scmp.ne.s32.totalorder %s1400_s10, %s1073_s27  ;;  %p1077_p6 = scmp.lt.u32.totalorder %s1073_s27, %s1400_s10 }
 0x349   :  { %p1079_p7 = pnand %p1077_p6, %p1074_p5 }
 0x34b   :  { %1082 = shalt.err (!%p1079_p7)
}
 0x34c   :  { %783 = dma.vmem_to_hbm [thread:$0]  %s781_s25, 128, %s1400_s10, [#allocation6]   ;;  %v738_v57 = vmul.f32 1.442695, %v737_v53  ;;  %v736_v59 = vld [vmem:[#allocation4] sm:$0xff]  ;;  %v758_v3 = vld [vmem:[#allocation3] sm:$0xff] }
 0x34e   :  { %1057 = vpow2.f32 %v738_v57 }
 0x358   :  { %v1058_v58 = vpop.eup %1057 }
 0x359   :  { %v740_v60 = vmul.f32 %v1058_v58, %v736_v59 }
 0x3d1   :  { %v750_v61 = vpop.xlane.xlu1 %749 }
 0x3d2   :  { %v751_v62 = vadd.f32 %v750_v61, %v740_v60 }
 0x3d4   :  { %753 = vst.msk [vmem:[#allocation4] sm:$0xff] %vm616_vm1, %v751_v62 }
 0x3db   :  { %v759_v63 = vld [vmem:[#allocation4] sm:$0xff] }
 0x3dc   :  { %1059 = vlog2.f32 %v759_v63 }
 0x3e6   :  { %v1060_v0 = vpop.eup %1059 }
 0x3e7   :  { %v761_v1 = vmul.f32 0.6931472, %v1060_v0 }
 0x3e9   :  { %v762_v4 = vadd.f32 %v761_v1, %v758_v3 }
 0x3eb   :  { %763 = vst.msk [vmem:[%s1399_s9] sm:$0xff] %vm616_vm1, %v762_v4 }
 0x3ec   :  { %1083 = dma.done.wait [#allocation6], 128  }
 0x3ed   :  { %1084 = vsyncadd [#allocation6], 4294967168 }
 0x3ee   :  { %796 = vsyncpa [#allocation6], 1 }

</bundles_post_ra>
